<compile_context>
chip_gen: v7x
topology: tpu7x:2x2x1
jax: 0.10.0
libtpu: 0.0.40
codegen_flags: <defaults>
</compile_context>

<pallas_src>
import functools

import jax
import jax.numpy as jnp
from jax.experimental import pallas as pl
from jax.experimental.pallas import tpu as pltpu


# ----------------------------------------------------------------------------
# Fused kernel: LSTM stack (fori_loop over time, state in VMEM) + dense head.
# ----------------------------------------------------------------------------
def _make_fused_kernel(num_layers, seq_len, last_batch_idx, unroll):
    """Build the fused TextLSTM forward kernel (single invocation, no grid)."""

    def kernel(*refs):
        # ---- unpack refs: inputs, output, scratch (order fixed by wrapper) ----
        idx = 0
        x_ref = refs[idx]; idx += 1                           # (S, Bp, IN)
        layers = []
        for _ in range(num_layers):
            layers.append((refs[idx], refs[idx + 1], refs[idx + 2]))
            idx += 3                                          # (in,4H), (H,4H), (1,4H)
        w1_ref, b1_ref, w2_ref, b2_ref = refs[idx:idx + 4]; idx += 4
        out_ref = refs[idx]; idx += 1                         # (S, OUT_PAD)
        seq_buf, xproj_buf, h_scr, c_scr = refs[idx:idx + 4]  # VMEM scratch

        S, Bp, H = seq_buf.shape
        H3 = 3 * H

        # ---- LSTM stack ----
        for layer in range(num_layers):
            wih_ref, whh_ref, b_ref = layers[layer]
            src_ref = x_ref if layer == 0 else seq_buf        # in-place: src fully
            in_dim = src_ref.shape[-1]                        # consumed into xproj below
            cdt = wih_ref.dtype                               # matmul compute dtype

            # Hoisted input projection for ALL timesteps (one big lane-dense matmul),
            # bias folded in once (no per-step broadcast in the unrolled loop).
            src_flat = src_ref[...].reshape(S * Bp, in_dim).astype(cdt)
            xp = jnp.dot(src_flat, wih_ref[...], preferred_element_type=jnp.float32)
            xproj_buf[...] = (xp + b_ref[...]).reshape(S, Bp, 4 * H)

            h_scr[...] = jnp.zeros_like(h_scr)
            c_scr[...] = jnp.zeros_like(c_scr)

            def step(t, carry):
                h_prev = h_scr[...]                           # (Bp, H) f32
                c_prev = c_scr[...]                           # (Bp, H) f32
                # Single recurrent dot per step: (Bp, H) @ (H, 4H).
                pre = xproj_buf[t] + jnp.dot(
                    h_prev.astype(cdt), whh_ref[...],
                    preferred_element_type=jnp.float32)       # (Bp, 4H) f32
                # Gate order [i, f, o, g]; i/f/o columns were pre-scaled by 0.5 in
                # prepare_params, so ONE tanh covers all gates:
                #   sigmoid(x) = 0.5 * tanh(0.5 * x) + 0.5   (i, f, o)
                #   tanh(x)                                   (g)
                t_all = jnp.tanh(pre)
                ifo = t_all[:, :H3] * 0.5 + 0.5
                i_g = ifo[:, :H]
                f_g = ifo[:, H:2 * H]
                o_g = ifo[:, 2 * H:]
                g_g = t_all[:, H3:]

                c_new = f_g * c_prev + i_g * g_g
                h_new = o_g * jnp.tanh(c_new)

                h_scr[...] = h_new
                c_scr[...] = c_new
                seq_buf[t] = h_new     # in place: layer input already in xproj_buf
                return carry

            jax.lax.fori_loop(0, seq_len, step, 0, unroll=unroll)

        seq = seq_buf[...]                                    # (S, Bp, H)

        # PyTorch: x = x[:, -1, :]  -> last element of the *batch* axis (time-major
        # quirk of the original module). last_batch_idx is the ORIGINAL B-1, so padded
        # batch rows (which hold garbage gate values) are never read.
        h_last = seq[:, last_batch_idx, :]                    # (S, H)

        # relu -> linear1 -> relu -> dropout(identity at inference) -> linear2
        # TODO(synk): training-mode dropout (RNG mask) not implemented; eval identity only.
        h_last = jnp.maximum(h_last, 0.0)
        cdt = w1_ref.dtype
        z = jnp.dot(h_last.astype(cdt), w1_ref[...],
                    preferred_element_type=jnp.float32) + b1_ref[...]
        z = jnp.maximum(z, 0.0)
        out_ref[...] = (
            jnp.dot(z.astype(cdt), w2_ref[...],
                    preferred_element_type=jnp.float32) + b2_ref[...]
        )

    return kernel


# ----------------------------------------------------------------------------
# Forward wrapper (jitted): pad batch to 8 sublanes, run one fused kernel,
# slice the lane-padded logits.
# ----------------------------------------------------------------------------
@functools.partial(jax.jit, static_argnames=("output_dim",))
def text_lstm_forward(x, prep, *, output_dim):
    """x: (seq_len, batch, input_size) -> logits (seq_len, output_dim)."""
    S, B, _ = x.shape
    lstm = prep["lstm"]
    num_layers = len(lstm)
    H = lstm[0][1].shape[0]                   # whh: (H, 4H)
    out_pad_dim = prep["w2_t_pad"].shape[-1]  # 128-lane padded output width

    # Pad batch to the f32 sublane tile (8): full-tile vector ops / stores in-kernel.
    b_pad = ((B + 7) // 8) * 8
    if b_pad != B:
        x = jnp.pad(x, ((0, 0), (0, b_pad - B), (0, 0)))

    inputs = [x]
    for (wih, whh, b) in lstm:
        inputs += [wih, whh, b]
    inputs += [prep["w1_t"], prep["b1"], prep["w2_t_pad"], prep["b2_pad"]]

    scratch = [
        pltpu.VMEM((S, b_pad, H), jnp.float32),       # layer output sequence (in-place)
        pltpu.VMEM((S, b_pad, 4 * H), jnp.float32),   # hoisted x-projection (+bias)
        pltpu.VMEM((b_pad, H), jnp.float32),          # h state (f32)
        pltpu.VMEM((b_pad, H), jnp.float32),          # c state (f32)
    ]

    # Explicit VMEM budget (re-derived per problem size): inputs (double buffered by
    # the runtime), output, scratch, plus headroom; clamped to v7x's 64 MiB physical.
    def nbytes(a):
        return a.size * a.dtype.itemsize
    in_bytes = sum(nbytes(a) for a in inputs)
    scr_bytes = (S * b_pad * H + S * b_pad * 4 * H + 2 * b_pad * H) * 4
    out_bytes = S * out_pad_dim * 4
    vmem_limit = int(min(max(2 * (in_bytes + out_bytes) + scr_bytes + (4 << 20),
                             16 << 20), 64 << 20))

    kernel = _make_fused_kernel(num_layers, S, B - 1, unroll=min(S, 8))

    out = pl.pallas_call(
        kernel,
        out_shape=jax.ShapeDtypeStruct((S, out_pad_dim), jnp.float32),
        scratch_shapes=scratch,
        compiler_params=pltpu.CompilerParams(vmem_limit_bytes=vmem_limit),
    )(*inputs)

    return out[:, :output_dim]


# ----------------------------------------------------------------------------
# Parameter init (PyTorch shapes) and one-time conversion to kernel layout.
# ----------------------------------------------------------------------------
def init_params(key, input_size, output_dim, hidden_size, num_layers):
    """Deterministic init matching PyTorch parameter shapes (U[-1/sqrt(H), 1/sqrt(H)])."""
    k = 1.0 / jnp.sqrt(jnp.float32(hidden_size))
    keys = jax.random.split(key, 4 * num_layers + 4)
    lstm_params = []
    ki = 0
    for layer in range(num_layers):
        in_dim = input_size if layer == 0 else hidden_size
        w_ih = jax.random.uniform(keys[ki + 0], (4 * hidden_size, in_dim),
                                  jnp.float32, -k, k)
        w_hh = jax.random.uniform(keys[ki + 1], (4 * hidden_size, hidden_size),
                                  jnp.float32, -k, k)
        b_ih = jax.random.uniform(keys[ki + 2], (4 * hidden_size,), jnp.float32, -k, k)
        b_hh = jax.random.uniform(keys[ki + 3], (4 * hidden_size,), jnp.float32, -k, k)
        lstm_params.append((w_ih, w_hh, b_ih, b_hh))
        ki += 4
    k1 = 1.0 / jnp.sqrt(jnp.float32(hidden_size))
    w1 = jax.random.uniform(keys[ki + 0], (128, hidden_size), jnp.float32, -k1, k1)
    b1 = jax.random.uniform(keys[ki + 1], (128,), jnp.float32, -k1, k1)
    k2 = 1.0 / jnp.sqrt(jnp.float32(128))
    w2 = jax.random.uniform(keys[ki + 2], (output_dim, 128), jnp.float32, -k2, k2)
    b2 = jax.random.uniform(keys[ki + 3], (output_dim,), jnp.float32, -k2, k2)
    return {"lstm": lstm_params, "w1": w1, "b1": b1, "w2": w2, "b2": b2}


def _fuse_gates(w, h, scale_ifo):
    """(4H, in) PyTorch gate layout [i,f,g,o] -> fused, reordered [i,f,o,g] (in, 4H),
    with i/f/o columns pre-scaled by 0.5 (sigmoid-via-tanh trick)."""
    wg = w.reshape(4, h, -1)
    wg = jnp.stack([wg[0], wg[1], wg[3], wg[2]], axis=0) * scale_ifo[:, None, None]
    return jnp.transpose(wg, (2, 0, 1)).reshape(w.shape[1], 4 * h)


def _fuse_bias(b_ih, b_hh, h, scale_ifo):
    b = (b_ih + b_hh).reshape(4, h)
    b = jnp.stack([b[0], b[1], b[3], b[2]], axis=0) * scale_ifo[:, None]
    return b.reshape(1, 4 * h)


def prepare_params(params, compute_dtype=jnp.bfloat16):
    """One-time conversion of PyTorch-layout weights to kernel-ready layout:
    gates fused into a single lane-dense (.,4H) RHS, reordered [i,f,o,g], i/f/o columns
    pre-scaled by 0.5, biases combined, matmul weights cast to compute_dtype (biases and
    accumulation stay f32), head output lane-padded to 128."""
    scale_ifo = jnp.array([0.5, 0.5, 0.5, 1.0], jnp.float32)
    prep_lstm = []
    for (w_ih, w_hh, b_ih, b_hh) in params["lstm"]:
        h = w_hh.shape[1]
        wih = _fuse_gates(w_ih, h, scale_ifo).astype(compute_dtype)   # (in, 4H)
        whh = _fuse_gates(w_hh, h, scale_ifo).astype(compute_dtype)   # (H, 4H)
        b = _fuse_bias(b_ih, b_hh, h, scale_ifo)                      # (1, 4H) f32
        prep_lstm.append((wih, whh, b))

    w1_t = params["w1"].T.astype(compute_dtype)              # (H, 128)
    b1 = params["b1"].reshape(1, -1)                         # (1, 128) f32

    out_dim = params["w2"].shape[0]
    out_pad = ((out_dim + 127) // 128) * 128                 # lane-dense final store
    w2_t = params["w2"].T                                    # (128, OUT)
    w2_t_pad = (jnp.zeros((w2_t.shape[0], out_pad), jnp.float32)
                .at[:, :out_dim].set(w2_t).astype(compute_dtype))
    b2_pad = jnp.zeros((1, out_pad), jnp.float32).at[:, :out_dim].set(params["b2"])

    return {"lstm": tuple(prep_lstm), "w1_t": w1_t, "b1": b1,
            "w2_t_pad": w2_t_pad, "b2_pad": b2_pad}


# ----------------------------------------------------------------------------
# Pure-JAX reference (mirrors the PyTorch module literally) for correctness.
# ----------------------------------------------------------------------------
def _reference_forward(x, raw):
    y = x
    for (w_ih, w_hh, b_ih, b_hh) in raw["lstm"]:
        s, b, _ = y.shape
        h_dim = w_hh.shape[1]
        h = jnp.zeros((b, h_dim), jnp.float32)
        c = jnp.zeros((b, h_dim), jnp.float32)
        outs = []
        for t in range(s):
            gates = y[t] @ w_ih.T + h @ w_hh.T + b_ih + b_hh
            i = jax.nn.sigmoid(gates[:, 0 * h_dim:1 * h_dim])
            f = jax.nn.sigmoid(gates[:, 1 * h_dim:2 * h_dim])
            g = jnp.tanh(gates[:, 2 * h_dim:3 * h_dim])
            o = jax.nn.sigmoid(gates[:, 3 * h_dim:4 * h_dim])
            c = f * c + i * g
            h = o * jnp.tanh(c)
            outs.append(h)
        y = jnp.stack(outs, axis=0)
    h_last = jnp.maximum(y[:, -1, :], 0.0)
    z = jnp.maximum(h_last @ raw["w1"].T + raw["b1"], 0.0)
    return z @ raw["w2"].T + raw["b2"]


if __name__ == "__main__":
    SEQ, BATCH = 8, 2
    INPUT_SIZE, HIDDEN, NUM_LAYERS, OUTPUT_DIM = 16, 32, 2, 4

    key = jax.random.PRNGKey(0)
    pkey, xkey = jax.random.split(key)
    raw_params = init_params(pkey, INPUT_SIZE, OUTPUT_DIM, HIDDEN, NUM_LAYERS)

    # layout: x is (seq_len, batch, input_size) — PyTorch nn.LSTM default (time-major)
    x = jax.random.normal(xkey, (SEQ, BATCH, INPUT_SIZE), jnp.float32)

    ref = _reference_forward(x, raw_params)

    # Strict correctness check with f32 matmul inputs.
    prep_f32 = prepare_params(raw_params, compute_dtype=jnp.float32)
    logits_f32 = jax.block_until_ready(
        text_lstm_forward(x, prep_f32, output_dim=OUTPUT_DIM))
    assert logits_f32.shape == (SEQ, OUTPUT_DIM), logits_f32.shape
    err_f32 = float(jnp.max(jnp.abs(logits_f32 - ref)))
    assert err_f32 < 1e-3, f"f32 max abs error vs reference: {err_f32}"

    # bf16 matmul-input variant (MXU-rate / VMEM win on v6e/v7x); h/c state and
    # accumulation stay f32, so only matmul rounding differs from the f32 reference.
    prep_bf16 = prepare_params(raw_params, compute_dtype=jnp.bfloat16)
    logits_bf16 = jax.block_until_ready(
        text_lstm_forward(x, prep_bf16, output_dim=OUTPUT_DIM))
    assert logits_bf16.shape == (SEQ, OUTPUT_DIM), logits_bf16.shape
    err_bf16 = float(jnp.max(jnp.abs(logits_bf16 - ref)))
    assert err_bf16 < 5e-2, f"bf16 max abs error vs reference: {err_bf16}"

    print("KERNEL_OK")
</pallas_src>

<mosaic_0001>
module attributes {stable_mosaic.version = 11 : i64} {
  func.func @kernel(%arg0: memref<8x8x16xf32, #tpu.memory_space<vmem>>, %arg1: memref<16x128xf32, #tpu.memory_space<vmem>>, %arg2: memref<32x128xf32, #tpu.memory_space<vmem>>, %arg3: memref<1x128xf32, #tpu.memory_space<vmem>>, %arg4: memref<32x128xf32, #tpu.memory_space<vmem>>, %arg5: memref<32x128xf32, #tpu.memory_space<vmem>>, %arg6: memref<1x128xf32, #tpu.memory_space<vmem>>, %arg7: memref<32x128xf32, #tpu.memory_space<vmem>>, %arg8: memref<1x128xf32, #tpu.memory_space<vmem>>, %arg9: memref<128x128xf32, #tpu.memory_space<vmem>>, %arg10: memref<1x128xf32, #tpu.memory_space<vmem>>, %arg11: memref<8x128xf32, #tpu.memory_space<vmem>>, %arg12: memref<8x8x32xf32, #tpu.memory_space<vmem>>, %arg13: memref<8x8x128xf32, #tpu.memory_space<vmem>>, %arg14: memref<8x32xf32, #tpu.memory_space<vmem>>, %arg15: memref<8x32xf32, #tpu.memory_space<vmem>>) attributes {dimension_semantics = [], scalar_prefetch = 0 : i64, scratch_operands = 4 : i64, tpu.core_type = #tpu.core_type<tc>} {
    %c0 = arith.constant 0 : index
    %c0_0 = arith.constant 0 : index
    %c0_1 = arith.constant 0 : index
    %0 = vector.load %arg0[%c0, %c0_0, %c0_1] : memref<8x8x16xf32, #tpu.memory_space<vmem>>, vector<8x8x16xf32>
    %1 = vector.shape_cast %0 : vector<8x8x16xf32> to vector<64x16xf32>
    %c0_2 = arith.constant 0 : index
    %c0_3 = arith.constant 0 : index
    %2 = vector.load %arg1[%c0_2, %c0_3] : memref<16x128xf32, #tpu.memory_space<vmem>>, vector<16x128xf32>
    %cst = arith.constant dense<0.000000e+00> : vector<64x128xf32>
    %3 = tpu.matmul %1, %2, %cst {dimension_numbers = #tpu.dot_dimension_numbers<[1], [0], [0], [1], [0, 0, 1, 1], [], []>} : vector<64x16xf32>, vector<16x128xf32>, vector<64x128xf32> -> vector<64x128xf32>
    %c0_4 = arith.constant 0 : index
    %c0_5 = arith.constant 0 : index
    %4 = vector.load %arg3[%c0_4, %c0_5] : memref<1x128xf32, #tpu.memory_space<vmem>>, vector<1x128xf32>
    %5 = vector.broadcast %4 : vector<1x128xf32> to vector<64x128xf32>
    %6 = arith.addf %3, %5 : vector<64x128xf32>
    %7 = vector.shape_cast %6 : vector<64x128xf32> to vector<8x8x128xf32>
    %c0_6 = arith.constant 0 : index
    %c0_7 = arith.constant 0 : index
    %c0_8 = arith.constant 0 : index
    %8 = vector.load %arg13[%c0_6, %c0_7, %c0_8] : memref<8x8x128xf32, #tpu.memory_space<vmem>>, vector<8x8x128xf32>
    tpu.vector_store %arg13[%c0_6, %c0_7, %c0_8], %7 {strides = array<i32>} : memref<8x8x128xf32, #tpu.memory_space<vmem>>, vector<8x8x128xf32>,
    %cst_9 = arith.constant 0.000000e+00 : f32
    %9 = vector.broadcast %cst_9 : f32 to vector<8x32xf32>
    %c0_10 = arith.constant 0 : index
    %c0_11 = arith.constant 0 : index
    %10 = vector.load %arg14[%c0_10, %c0_11] : memref<8x32xf32, #tpu.memory_space<vmem>>, vector<8x32xf32>
    tpu.vector_store %arg14[%c0_10, %c0_11], %9 {strides = array<i32>} : memref<8x32xf32, #tpu.memory_space<vmem>>, vector<8x32xf32>,
    %cst_12 = arith.constant 0.000000e+00 : f32
    %11 = vector.broadcast %cst_12 : f32 to vector<8x32xf32>
    %c0_13 = arith.constant 0 : index
    %c0_14 = arith.constant 0 : index
    %12 = vector.load %arg15[%c0_13, %c0_14] : memref<8x32xf32, #tpu.memory_space<vmem>>, vector<8x32xf32>
    tpu.vector_store %arg15[%c0_13, %c0_14], %11 {strides = array<i32>} : memref<8x32xf32, #tpu.memory_space<vmem>>, vector<8x32xf32>,
    %c0_i32 = arith.constant 0 : i32
    %c0_15 = arith.constant 0 : index
    %c0_16 = arith.constant 0 : index
    %13 = vector.load %arg14[%c0_15, %c0_16] : memref<8x32xf32, #tpu.memory_space<vmem>>, vector<8x32xf32>
    %c0_17 = arith.constant 0 : index
    %c0_18 = arith.constant 0 : index
    %14 = vector.load %arg15[%c0_17, %c0_18] : memref<8x32xf32, #tpu.memory_space<vmem>>, vector<8x32xf32>
    %15 = arith.index_cast %c0_i32 : i32 to index
    %c0_19 = arith.constant 0 : index
    %c0_20 = arith.constant 0 : index
    %16 = vector.load %arg13[%15, %c0_19, %c0_20] : memref<8x8x128xf32, #tpu.memory_space<vmem>>, vector<1x8x128xf32>
    %17 = vector.shape_cast %16 : vector<1x8x128xf32> to vector<8x128xf32>
    %c0_21 = arith.constant 0 : index
    %c0_22 = arith.constant 0 : index
    %18 = vector.load %arg2[%c0_21, %c0_22] : memref<32x128xf32, #tpu.memory_space<vmem>>, vector<32x128xf32>
    %cst_23 = arith.constant dense<0.000000e+00> : vector<8x128xf32>
    %19 = tpu.matmul %13, %18, %cst_23 {dimension_numbers = #tpu.dot_dimension_numbers<[1], [0], [0], [1], [0, 0, 1, 1], [], []>} : vector<8x32xf32>, vector<32x128xf32>, vector<8x128xf32> -> vector<8x128xf32>
    %20 = arith.addf %17, %19 : vector<8x128xf32>
    %21 = math.tanh %20 : vector<8x128xf32>
    %22 = vector.extract_strided_slice %21 {offsets = [0, 0], sizes = [8, 96], strides = [1, 1]} : vector<8x128xf32> to vector<8x96xf32>
    %cst_24 = arith.constant 5.000000e-01 : f32
    %23 = vector.broadcast %cst_24 : f32 to vector<8x96xf32>
    %24 = arith.mulf %22, %23 : vector<8x96xf32>
    %cst_25 = arith.constant 5.000000e-01 : f32
    %25 = vector.broadcast %cst_25 : f32 to vector<8x96xf32>
    %26 = arith.addf %24, %25 : vector<8x96xf32>
    %27 = vector.extract_strided_slice %26 {offsets = [0, 0], sizes = [8, 32], strides = [1, 1]} : vector<8x96xf32> to vector<8x32xf32>
    %28 = vector.extract_strided_slice %26 {offsets = [0, 32], sizes = [8, 32], strides = [1, 1]} : vector<8x96xf32> to vector<8x32xf32>
    %29 = vector.extract_strided_slice %26 {offsets = [0, 64], sizes = [8, 32], strides = [1, 1]} : vector<8x96xf32> to vector<8x32xf32>
    %30 = vector.extract_strided_slice %21 {offsets = [0, 96], sizes = [8, 32], strides = [1, 1]} : vector<8x128xf32> to vector<8x32xf32>
    %31 = arith.mulf %28, %14 : vector<8x32xf32>
    %32 = arith.mulf %27, %30 : vector<8x32xf32>
    %33 = arith.addf %31, %32 : vector<8x32xf32>
    %34 = math.tanh %33 : vector<8x32xf32>
    %35 = arith.mulf %29, %34 : vector<8x32xf32>
    %c0_26 = arith.constant 0 : index
    %c0_27 = arith.constant 0 : index
    %36 = vector.load %arg14[%c0_26, %c0_27] : memref<8x32xf32, #tpu.memory_space<vmem>>, vector<8x32xf32>
    tpu.vector_store %arg14[%c0_26, %c0_27], %35 {strides = array<i32>} : memref<8x32xf32, #tpu.memory_space<vmem>>, vector<8x32xf32>,
    %c0_28 = arith.constant 0 : index
    %c0_29 = arith.constant 0 : index
    %37 = vector.load %arg15[%c0_28, %c0_29] : memref<8x32xf32, #tpu.memory_space<vmem>>, vector<8x32xf32>
    tpu.vector_store %arg15[%c0_28, %c0_29], %33 {strides = array<i32>} : memref<8x32xf32, #tpu.memory_space<vmem>>, vector<8x32xf32>,
    %38 = arith.index_cast %c0_i32 : i32 to index
    %c0_30 = arith.constant 0 : index
    %c0_31 = arith.constant 0 : index
    %39 = vector.load %arg12[%38, %c0_30, %c0_31] : memref<8x8x32xf32, #tpu.memory_space<vmem>>, vector<1x8x32xf32>
    %40 = vector.shape_cast %39 : vector<1x8x32xf32> to vector<8x32xf32>
    %41 = vector.shape_cast %35 : vector<8x32xf32> to vector<1x8x32xf32>
    tpu.vector_store %arg12[%38, %c0_30, %c0_31], %41 {strides = array<i32>} : memref<8x8x32xf32, #tpu.memory_space<vmem>>, vector<1x8x32xf32>,
    %c1_i32 = arith.constant 1 : i32
    %c0_32 = arith.constant 0 : index
    %c0_33 = arith.constant 0 : index
    %42 = vector.load %arg14[%c0_32, %c0_33] : memref<8x32xf32, #tpu.memory_space<vmem>>, vector<8x32xf32>
    %c0_34 = arith.constant 0 : index
    %c0_35 = arith.constant 0 : index
    %43 = vector.load %arg15[%c0_34, %c0_35] : memref<8x32xf32, #tpu.memory_space<vmem>>, vector<8x32xf32>
    %44 = arith.index_cast %c1_i32 : i32 to index
    %c0_36 = arith.constant 0 : index
    %c0_37 = arith.constant 0 : index
    %45 = vector.load %arg13[%44, %c0_36, %c0_37] : memref<8x8x128xf32, #tpu.memory_space<vmem>>, vector<1x8x128xf32>
    %46 = vector.shape_cast %45 : vector<1x8x128xf32> to vector<8x128xf32>
    %c0_38 = arith.constant 0 : index
    %c0_39 = arith.constant 0 : index
    %47 = vector.load %arg2[%c0_38, %c0_39] : memref<32x128xf32, #tpu.memory_space<vmem>>, vector<32x128xf32>
    %cst_40 = arith.constant dense<0.000000e+00> : vector<8x128xf32>
    %48 = tpu.matmul %42, %47, %cst_40 {dimension_numbers = #tpu.dot_dimension_numbers<[1], [0], [0], [1], [0, 0, 1, 1], [], []>} : vector<8x32xf32>, vector<32x128xf32>, vector<8x128xf32> -> vector<8x128xf32>
    %49 = arith.addf %46, %48 : vector<8x128xf32>
    %50 = math.tanh %49 : vector<8x128xf32>
    %51 = vector.extract_strided_slice %50 {offsets = [0, 0], sizes = [8, 96], strides = [1, 1]} : vector<8x128xf32> to vector<8x96xf32>
    %cst_41 = arith.constant 5.000000e-01 : f32
    %52 = vector.broadcast %cst_41 : f32 to vector<8x96xf32>
    %53 = arith.mulf %51, %52 : vector<8x96xf32>
    %cst_42 = arith.constant 5.000000e-01 : f32
    %54 = vector.broadcast %cst_42 : f32 to vector<8x96xf32>
    %55 = arith.addf %53, %54 : vector<8x96xf32>
    %56 = vector.extract_strided_slice %55 {offsets = [0, 0], sizes = [8, 32], strides = [1, 1]} : vector<8x96xf32> to vector<8x32xf32>
    %57 = vector.extract_strided_slice %55 {offsets = [0, 32], sizes = [8, 32], strides = [1, 1]} : vector<8x96xf32> to vector<8x32xf32>
    %58 = vector.extract_strided_slice %55 {offsets = [0, 64], sizes = [8, 32], strides = [1, 1]} : vector<8x96xf32> to vector<8x32xf32>
    %59 = vector.extract_strided_slice %50 {offsets = [0, 96], sizes = [8, 32], strides = [1, 1]} : vector<8x128xf32> to vector<8x32xf32>
    %60 = arith.mulf %57, %43 : vector<8x32xf32>
    %61 = arith.mulf %56, %59 : vector<8x32xf32>
    %62 = arith.addf %60, %61 : vector<8x32xf32>
    %63 = math.tanh %62 : vector<8x32xf32>
    %64 = arith.mulf %58, %63 : vector<8x32xf32>
    %c0_43 = arith.constant 0 : index
    %c0_44 = arith.constant 0 : index
    %65 = vector.load %arg14[%c0_43, %c0_44] : memref<8x32xf32, #tpu.memory_space<vmem>>, vector<8x32xf32>
    tpu.vector_store %arg14[%c0_43, %c0_44], %64 {strides = array<i32>} : memref<8x32xf32, #tpu.memory_space<vmem>>, vector<8x32xf32>,
    %c0_45 = arith.constant 0 : index
    %c0_46 = arith.constant 0 : index
    %66 = vector.load %arg15[%c0_45, %c0_46] : memref<8x32xf32, #tpu.memory_space<vmem>>, vector<8x32xf32>
    tpu.vector_store %arg15[%c0_45, %c0_46], %62 {strides = array<i32>} : memref<8x32xf32, #tpu.memory_space<vmem>>, vector<8x32xf32>,
    %67 = arith.index_cast %c1_i32 : i32 to index
    %c0_47 = arith.constant 0 : index
    %c0_48 = arith.constant 0 : index
    %68 = vector.load %arg12[%67, %c0_47, %c0_48] : memref<8x8x32xf32, #tpu.memory_space<vmem>>, vector<1x8x32xf32>
    %69 = vector.shape_cast %68 : vector<1x8x32xf32> to vector<8x32xf32>
    %70 = vector.shape_cast %64 : vector<8x32xf32> to vector<1x8x32xf32>
    tpu.vector_store %arg12[%67, %c0_47, %c0_48], %70 {strides = array<i32>} : memref<8x8x32xf32, #tpu.memory_space<vmem>>, vector<1x8x32xf32>,
    %c2_i32 = arith.constant 2 : i32
    %c0_49 = arith.constant 0 : index
    %c0_50 = arith.constant 0 : index
    %71 = vector.load %arg14[%c0_49, %c0_50] : memref<8x32xf32, #tpu.memory_space<vmem>>, vector<8x32xf32>
    %c0_51 = arith.constant 0 : index
    %c0_52 = arith.constant 0 : index
    %72 = vector.load %arg15[%c0_51, %c0_52] : memref<8x32xf32, #tpu.memory_space<vmem>>, vector<8x32xf32>
    %73 = arith.index_cast %c2_i32 : i32 to index
    %c0_53 = arith.constant 0 : index
    %c0_54 = arith.constant 0 : index
    %74 = vector.load %arg13[%73, %c0_53, %c0_54] : memref<8x8x128xf32, #tpu.memory_space<vmem>>, vector<1x8x128xf32>
    %75 = vector.shape_cast %74 : vector<1x8x128xf32> to vector<8x128xf32>
    %c0_55 = arith.constant 0 : index
    %c0_56 = arith.constant 0 : index
    %76 = vector.load %arg2[%c0_55, %c0_56] : memref<32x128xf32, #tpu.memory_space<vmem>>, vector<32x128xf32>
    %cst_57 = arith.constant dense<0.000000e+00> : vector<8x128xf32>
    %77 = tpu.matmul %71, %76, %cst_57 {dimension_numbers = #tpu.dot_dimension_numbers<[1], [0], [0], [1], [0, 0, 1, 1], [], []>} : vector<8x32xf32>, vector<32x128xf32>, vector<8x128xf32> -> vector<8x128xf32>
    %78 = arith.addf %75, %77 : vector<8x128xf32>
    %79 = math.tanh %78 : vector<8x128xf32>
    %80 = vector.extract_strided_slice %79 {offsets = [0, 0], sizes = [8, 96], strides = [1, 1]} : vector<8x128xf32> to vector<8x96xf32>
    %cst_58 = arith.constant 5.000000e-01 : f32
    %81 = vector.broadcast %cst_58 : f32 to vector<8x96xf32>
    %82 = arith.mulf %80, %81 : vector<8x96xf32>
    %cst_59 = arith.constant 5.000000e-01 : f32
    %83 = vector.broadcast %cst_59 : f32 to vector<8x96xf32>
    %84 = arith.addf %82, %83 : vector<8x96xf32>
    %85 = vector.extract_strided_slice %84 {offsets = [0, 0], sizes = [8, 32], strides = [1, 1]} : vector<8x96xf32> to vector<8x32xf32>
    %86 = vector.extract_strided_slice %84 {offsets = [0, 32], sizes = [8, 32], strides = [1, 1]} : vector<8x96xf32> to vector<8x32xf32>
    %87 = vector.extract_strided_slice %84 {offsets = [0, 64], sizes = [8, 32], strides = [1, 1]} : vector<8x96xf32> to vector<8x32xf32>
    %88 = vector.extract_strided_slice %79 {offsets = [0, 96], sizes = [8, 32], strides = [1, 1]} : vector<8x128xf32> to vector<8x32xf32>
    %89 = arith.mulf %86, %72 : vector<8x32xf32>
    %90 = arith.mulf %85, %88 : vector<8x32xf32>
    %91 = arith.addf %89, %90 : vector<8x32xf32>
    %92 = math.tanh %91 : vector<8x32xf32>
    %93 = arith.mulf %87, %92 : vector<8x32xf32>
    %c0_60 = arith.constant 0 : index
    %c0_61 = arith.constant 0 : index
    %94 = vector.load %arg14[%c0_60, %c0_61] : memref<8x32xf32, #tpu.memory_space<vmem>>, vector<8x32xf32>
    tpu.vector_store %arg14[%c0_60, %c0_61], %93 {strides = array<i32>} : memref<8x32xf32, #tpu.memory_space<vmem>>, vector<8x32xf32>,
    %c0_62 = arith.constant 0 : index
    %c0_63 = arith.constant 0 : index
    %95 = vector.load %arg15[%c0_62, %c0_63] : memref<8x32xf32, #tpu.memory_space<vmem>>, vector<8x32xf32>
    tpu.vector_store %arg15[%c0_62, %c0_63], %91 {strides = array<i32>} : memref<8x32xf32, #tpu.memory_space<vmem>>, vector<8x32xf32>,
    %96 = arith.index_cast %c2_i32 : i32 to index
    %c0_64 = arith.constant 0 : index
    %c0_65 = arith.constant 0 : index
    %97 = vector.load %arg12[%96, %c0_64, %c0_65] : memref<8x8x32xf32, #tpu.memory_space<vmem>>, vector<1x8x32xf32>
    %98 = vector.shape_cast %97 : vector<1x8x32xf32> to vector<8x32xf32>
    %99 = vector.shape_cast %93 : vector<8x32xf32> to vector<1x8x32xf32>
    tpu.vector_store %arg12[%96, %c0_64, %c0_65], %99 {strides = array<i32>} : memref<8x8x32xf32, #tpu.memory_space<vmem>>, vector<1x8x32xf32>,
    %c3_i32 = arith.constant 3 : i32
    %c0_66 = arith.constant 0 : index
    %c0_67 = arith.constant 0 : index
    %100 = vector.load %arg14[%c0_66, %c0_67] : memref<8x32xf32, #tpu.memory_space<vmem>>, vector<8x32xf32>
    %c0_68 = arith.constant 0 : index
    %c0_69 = arith.constant 0 : index
    %101 = vector.load %arg15[%c0_68, %c0_69] : memref<8x32xf32, #tpu.memory_space<vmem>>, vector<8x32xf32>
    %102 = arith.index_cast %c3_i32 : i32 to index
    %c0_70 = arith.constant 0 : index
    %c0_71 = arith.constant 0 : index
    %103 = vector.load %arg13[%102, %c0_70, %c0_71] : memref<8x8x128xf32, #tpu.memory_space<vmem>>, vector<1x8x128xf32>
    %104 = vector.shape_cast %103 : vector<1x8x128xf32> to vector<8x128xf32>
    %c0_72 = arith.constant 0 : index
    %c0_73 = arith.constant 0 : index
    %105 = vector.load %arg2[%c0_72, %c0_73] : memref<32x128xf32, #tpu.memory_space<vmem>>, vector<32x128xf32>
    %cst_74 = arith.constant dense<0.000000e+00> : vector<8x128xf32>
    %106 = tpu.matmul %100, %105, %cst_74 {dimension_numbers = #tpu.dot_dimension_numbers<[1], [0], [0], [1], [0, 0, 1, 1], [], []>} : vector<8x32xf32>, vector<32x128xf32>, vector<8x128xf32> -> vector<8x128xf32>
    %107 = arith.addf %104, %106 : vector<8x128xf32>
    %108 = math.tanh %107 : vector<8x128xf32>
    %109 = vector.extract_strided_slice %108 {offsets = [0, 0], sizes = [8, 96], strides = [1, 1]} : vector<8x128xf32> to vector<8x96xf32>
    %cst_75 = arith.constant 5.000000e-01 : f32
    %110 = vector.broadcast %cst_75 : f32 to vector<8x96xf32>
    %111 = arith.mulf %109, %110 : vector<8x96xf32>
    %cst_76 = arith.constant 5.000000e-01 : f32
    %112 = vector.broadcast %cst_76 : f32 to vector<8x96xf32>
    %113 = arith.addf %111, %112 : vector<8x96xf32>
    %114 = vector.extract_strided_slice %113 {offsets = [0, 0], sizes = [8, 32], strides = [1, 1]} : vector<8x96xf32> to vector<8x32xf32>
    %115 = vector.extract_strided_slice %113 {offsets = [0, 32], sizes = [8, 32], strides = [1, 1]} : vector<8x96xf32> to vector<8x32xf32>
    %116 = vector.extract_strided_slice %113 {offsets = [0, 64], sizes = [8, 32], strides = [1, 1]} : vector<8x96xf32> to vector<8x32xf32>
    %117 = vector.extract_strided_slice %108 {offsets = [0, 96], sizes = [8, 32], strides = [1, 1]} : vector<8x128xf32> to vector<8x32xf32>
    %118 = arith.mulf %115, %101 : vector<8x32xf32>
    %119 = arith.mulf %114, %117 : vector<8x32xf32>
    %120 = arith.addf %118, %119 : vector<8x32xf32>
    %121 = math.tanh %120 : vector<8x32xf32>
    %122 = arith.mulf %116, %121 : vector<8x32xf32>
    %c0_77 = arith.constant 0 : index
    %c0_78 = arith.constant 0 : index
    %123 = vector.load %arg14[%c0_77, %c0_78] : memref<8x32xf32, #tpu.memory_space<vmem>>, vector<8x32xf32>
    tpu.vector_store %arg14[%c0_77, %c0_78], %122 {strides = array<i32>} : memref<8x32xf32, #tpu.memory_space<vmem>>, vector<8x32xf32>,
    %c0_79 = arith.constant 0 : index
    %c0_80 = arith.constant 0 : index
    %124 = vector.load %arg15[%c0_79, %c0_80] : memref<8x32xf32, #tpu.memory_space<vmem>>, vector<8x32xf32>
    tpu.vector_store %arg15[%c0_79, %c0_80], %120 {strides = array<i32>} : memref<8x32xf32, #tpu.memory_space<vmem>>, vector<8x32xf32>,
    %125 = arith.index_cast %c3_i32 : i32 to index
    %c0_81 = arith.constant 0 : index
    %c0_82 = arith.constant 0 : index
    %126 = vector.load %arg12[%125, %c0_81, %c0_82] : memref<8x8x32xf32, #tpu.memory_space<vmem>>, vector<1x8x32xf32>
    %127 = vector.shape_cast %126 : vector<1x8x32xf32> to vector<8x32xf32>
    %128 = vector.shape_cast %122 : vector<8x32xf32> to vector<1x8x32xf32>
    tpu.vector_store %arg12[%125, %c0_81, %c0_82], %128 {strides = array<i32>} : memref<8x8x32xf32, #tpu.memory_space<vmem>>, vector<1x8x32xf32>,
    %c4_i32 = arith.constant 4 : i32
    %c0_83 = arith.constant 0 : index
    %c0_84 = arith.constant 0 : index
    %129 = vector.load %arg14[%c0_83, %c0_84] : memref<8x32xf32, #tpu.memory_space<vmem>>, vector<8x32xf32>
    %c0_85 = arith.constant 0 : index
    %c0_86 = arith.constant 0 : index
    %130 = vector.load %arg15[%c0_85, %c0_86] : memref<8x32xf32, #tpu.memory_space<vmem>>, vector<8x32xf32>
    %131 = arith.index_cast %c4_i32 : i32 to index
    %c0_87 = arith.constant 0 : index
    %c0_88 = arith.constant 0 : index
    %132 = vector.load %arg13[%131, %c0_87, %c0_88] : memref<8x8x128xf32, #tpu.memory_space<vmem>>, vector<1x8x128xf32>
    %133 = vector.shape_cast %132 : vector<1x8x128xf32> to vector<8x128xf32>
    %c0_89 = arith.constant 0 : index
    %c0_90 = arith.constant 0 : index
    %134 = vector.load %arg2[%c0_89, %c0_90] : memref<32x128xf32, #tpu.memory_space<vmem>>, vector<32x128xf32>
    %cst_91 = arith.constant dense<0.000000e+00> : vector<8x128xf32>
    %135 = tpu.matmul %129, %134, %cst_91 {dimension_numbers = #tpu.dot_dimension_numbers<[1], [0], [0], [1], [0, 0, 1, 1], [], []>} : vector<8x32xf32>, vector<32x128xf32>, vector<8x128xf32> -> vector<8x128xf32>
    %136 = arith.addf %133, %135 : vector<8x128xf32>
    %137 = math.tanh %136 : vector<8x128xf32>
    %138 = vector.extract_strided_slice %137 {offsets = [0, 0], sizes = [8, 96], strides = [1, 1]} : vector<8x128xf32> to vector<8x96xf32>
    %cst_92 = arith.constant 5.000000e-01 : f32
    %139 = vector.broadcast %cst_92 : f32 to vector<8x96xf32>
    %140 = arith.mulf %138, %139 : vector<8x96xf32>
    %cst_93 = arith.constant 5.000000e-01 : f32
    %141 = vector.broadcast %cst_93 : f32 to vector<8x96xf32>
    %142 = arith.addf %140, %141 : vector<8x96xf32>
    %143 = vector.extract_strided_slice %142 {offsets = [0, 0], sizes = [8, 32], strides = [1, 1]} : vector<8x96xf32> to vector<8x32xf32>
    %144 = vector.extract_strided_slice %142 {offsets = [0, 32], sizes = [8, 32], strides = [1, 1]} : vector<8x96xf32> to vector<8x32xf32>
    %145 = vector.extract_strided_slice %142 {offsets = [0, 64], sizes = [8, 32], strides = [1, 1]} : vector<8x96xf32> to vector<8x32xf32>
    %146 = vector.extract_strided_slice %137 {offsets = [0, 96], sizes = [8, 32], strides = [1, 1]} : vector<8x128xf32> to vector<8x32xf32>
    %147 = arith.mulf %144, %130 : vector<8x32xf32>
    %148 = arith.mulf %143, %146 : vector<8x32xf32>
    %149 = arith.addf %147, %148 : vector<8x32xf32>
    %150 = math.tanh %149 : vector<8x32xf32>
    %151 = arith.mulf %145, %150 : vector<8x32xf32>
    %c0_94 = arith.constant 0 : index
    %c0_95 = arith.constant 0 : index
    %152 = vector.load %arg14[%c0_94, %c0_95] : memref<8x32xf32, #tpu.memory_space<vmem>>, vector<8x32xf32>
    tpu.vector_store %arg14[%c0_94, %c0_95], %151 {strides = array<i32>} : memref<8x32xf32, #tpu.memory_space<vmem>>, vector<8x32xf32>,
    %c0_96 = arith.constant 0 : index
    %c0_97 = arith.constant 0 : index
    %153 = vector.load %arg15[%c0_96, %c0_97] : memref<8x32xf32, #tpu.memory_space<vmem>>, vector<8x32xf32>
    tpu.vector_store %arg15[%c0_96, %c0_97], %149 {strides = array<i32>} : memref<8x32xf32, #tpu.memory_space<vmem>>, vector<8x32xf32>,
    %154 = arith.index_cast %c4_i32 : i32 to index
    %c0_98 = arith.constant 0 : index
    %c0_99 = arith.constant 0 : index
    %155 = vector.load %arg12[%154, %c0_98, %c0_99] : memref<8x8x32xf32, #tpu.memory_space<vmem>>, vector<1x8x32xf32>
    %156 = vector.shape_cast %155 : vector<1x8x32xf32> to vector<8x32xf32>
    %157 = vector.shape_cast %151 : vector<8x32xf32> to vector<1x8x32xf32>
    tpu.vector_store %arg12[%154, %c0_98, %c0_99], %157 {strides = array<i32>} : memref<8x8x32xf32, #tpu.memory_space<vmem>>, vector<1x8x32xf32>,
    %c5_i32 = arith.constant 5 : i32
    %c0_100 = arith.constant 0 : index
    %c0_101 = arith.constant 0 : index
    %158 = vector.load %arg14[%c0_100, %c0_101] : memref<8x32xf32, #tpu.memory_space<vmem>>, vector<8x32xf32>
    %c0_102 = arith.constant 0 : index
    %c0_103 = arith.constant 0 : index
    %159 = vector.load %arg15[%c0_102, %c0_103] : memref<8x32xf32, #tpu.memory_space<vmem>>, vector<8x32xf32>
    %160 = arith.index_cast %c5_i32 : i32 to index
    %c0_104 = arith.constant 0 : index
    %c0_105 = arith.constant 0 : index
    %161 = vector.load %arg13[%160, %c0_104, %c0_105] : memref<8x8x128xf32, #tpu.memory_space<vmem>>, vector<1x8x128xf32>
    %162 = vector.shape_cast %161 : vector<1x8x128xf32> to vector<8x128xf32>
    %c0_106 = arith.constant 0 : index
    %c0_107 = arith.constant 0 : index
    %163 = vector.load %arg2[%c0_106, %c0_107] : memref<32x128xf32, #tpu.memory_space<vmem>>, vector<32x128xf32>
    %cst_108 = arith.constant dense<0.000000e+00> : vector<8x128xf32>
    %164 = tpu.matmul %158, %163, %cst_108 {dimension_numbers = #tpu.dot_dimension_numbers<[1], [0], [0], [1], [0, 0, 1, 1], [], []>} : vector<8x32xf32>, vector<32x128xf32>, vector<8x128xf32> -> vector<8x128xf32>
    %165 = arith.addf %162, %164 : vector<8x128xf32>
    %166 = math.tanh %165 : vector<8x128xf32>
    %167 = vector.extract_strided_slice %166 {offsets = [0, 0], sizes = [8, 96], strides = [1, 1]} : vector<8x128xf32> to vector<8x96xf32>
    %cst_109 = arith.constant 5.000000e-01 : f32
    %168 = vector.broadcast %cst_109 : f32 to vector<8x96xf32>
    %169 = arith.mulf %167, %168 : vector<8x96xf32>
    %cst_110 = arith.constant 5.000000e-01 : f32
    %170 = vector.broadcast %cst_110 : f32 to vector<8x96xf32>
    %171 = arith.addf %169, %170 : vector<8x96xf32>
    %172 = vector.extract_strided_slice %171 {offsets = [0, 0], sizes = [8, 32], strides = [1, 1]} : vector<8x96xf32> to vector<8x32xf32>
    %173 = vector.extract_strided_slice %171 {offsets = [0, 32], sizes = [8, 32], strides = [1, 1]} : vector<8x96xf32> to vector<8x32xf32>
    %174 = vector.extract_strided_slice %171 {offsets = [0, 64], sizes = [8, 32], strides = [1, 1]} : vector<8x96xf32> to vector<8x32xf32>
    %175 = vector.extract_strided_slice %166 {offsets = [0, 96], sizes = [8, 32], strides = [1, 1]} : vector<8x128xf32> to vector<8x32xf32>
    %176 = arith.mulf %173, %159 : vector<8x32xf32>
    %177 = arith.mulf %172, %175 : vector<8x32xf32>
    %178 = arith.addf %176, %177 : vector<8x32xf32>
    %179 = math.tanh %178 : vector<8x32xf32>
    %180 = arith.mulf %174, %179 : vector<8x32xf32>
    %c0_111 = arith.constant 0 : index
    %c0_112 = arith.constant 0 : index
    %181 = vector.load %arg14[%c0_111, %c0_112] : memref<8x32xf32, #tpu.memory_space<vmem>>, vector<8x32xf32>
    tpu.vector_store %arg14[%c0_111, %c0_112], %180 {strides = array<i32>} : memref<8x32xf32, #tpu.memory_space<vmem>>, vector<8x32xf32>,
    %c0_113 = arith.constant 0 : index
    %c0_114 = arith.constant 0 : index
    %182 = vector.load %arg15[%c0_113, %c0_114] : memref<8x32xf32, #tpu.memory_space<vmem>>, vector<8x32xf32>
    tpu.vector_store %arg15[%c0_113, %c0_114], %178 {strides = array<i32>} : memref<8x32xf32, #tpu.memory_space<vmem>>, vector<8x32xf32>,
    %183 = arith.index_cast %c5_i32 : i32 to index
    %c0_115 = arith.constant 0 : index
    %c0_116 = arith.constant 0 : index
    %184 = vector.load %arg12[%183, %c0_115, %c0_116] : memref<8x8x32xf32, #tpu.memory_space<vmem>>, vector<1x8x32xf32>
    %185 = vector.shape_cast %184 : vector<1x8x32xf32> to vector<8x32xf32>
    %186 = vector.shape_cast %180 : vector<8x32xf32> to vector<1x8x32xf32>
    tpu.vector_store %arg12[%183, %c0_115, %c0_116], %186 {strides = array<i32>} : memref<8x8x32xf32, #tpu.memory_space<vmem>>, vector<1x8x32xf32>,
    %c6_i32 = arith.constant 6 : i32
    %c0_117 = arith.constant 0 : index
    %c0_118 = arith.constant 0 : index
    %187 = vector.load %arg14[%c0_117, %c0_118] : memref<8x32xf32, #tpu.memory_space<vmem>>, vector<8x32xf32>
    %c0_119 = arith.constant 0 : index
    %c0_120 = arith.constant 0 : index
    %188 = vector.load %arg15[%c0_119, %c0_120] : memref<8x32xf32, #tpu.memory_space<vmem>>, vector<8x32xf32>
    %189 = arith.index_cast %c6_i32 : i32 to index
    %c0_121 = arith.constant 0 : index
    %c0_122 = arith.constant 0 : index
    %190 = vector.load %arg13[%189, %c0_121, %c0_122] : memref<8x8x128xf32, #tpu.memory_space<vmem>>, vector<1x8x128xf32>
    %191 = vector.shape_cast %190 : vector<1x8x128xf32> to vector<8x128xf32>
    %c0_123 = arith.constant 0 : index
    %c0_124 = arith.constant 0 : index
    %192 = vector.load %arg2[%c0_123, %c0_124] : memref<32x128xf32, #tpu.memory_space<vmem>>, vector<32x128xf32>
    %cst_125 = arith.constant dense<0.000000e+00> : vector<8x128xf32>
    %193 = tpu.matmul %187, %192, %cst_125 {dimension_numbers = #tpu.dot_dimension_numbers<[1], [0], [0], [1], [0, 0, 1, 1], [], []>} : vector<8x32xf32>, vector<32x128xf32>, vector<8x128xf32> -> vector<8x128xf32>
    %194 = arith.addf %191, %193 : vector<8x128xf32>
    %195 = math.tanh %194 : vector<8x128xf32>
    %196 = vector.extract_strided_slice %195 {offsets = [0, 0], sizes = [8, 96], strides = [1, 1]} : vector<8x128xf32> to vector<8x96xf32>
    %cst_126 = arith.constant 5.000000e-01 : f32
    %197 = vector.broadcast %cst_126 : f32 to vector<8x96xf32>
    %198 = arith.mulf %196, %197 : vector<8x96xf32>
    %cst_127 = arith.constant 5.000000e-01 : f32
    %199 = vector.broadcast %cst_127 : f32 to vector<8x96xf32>
    %200 = arith.addf %198, %199 : vector<8x96xf32>
    %201 = vector.extract_strided_slice %200 {offsets = [0, 0], sizes = [8, 32], strides = [1, 1]} : vector<8x96xf32> to vector<8x32xf32>
    %202 = vector.extract_strided_slice %200 {offsets = [0, 32], sizes = [8, 32], strides = [1, 1]} : vector<8x96xf32> to vector<8x32xf32>
    %203 = vector.extract_strided_slice %200 {offsets = [0, 64], sizes = [8, 32], strides = [1, 1]} : vector<8x96xf32> to vector<8x32xf32>
    %204 = vector.extract_strided_slice %195 {offsets = [0, 96], sizes = [8, 32], strides = [1, 1]} : vector<8x128xf32> to vector<8x32xf32>
    %205 = arith.mulf %202, %188 : vector<8x32xf32>
    %206 = arith.mulf %201, %204 : vector<8x32xf32>
    %207 = arith.addf %205, %206 : vector<8x32xf32>
    %208 = math.tanh %207 : vector<8x32xf32>
    %209 = arith.mulf %203, %208 : vector<8x32xf32>
    %c0_128 = arith.constant 0 : index
    %c0_129 = arith.constant 0 : index
    %210 = vector.load %arg14[%c0_128, %c0_129] : memref<8x32xf32, #tpu.memory_space<vmem>>, vector<8x32xf32>
    tpu.vector_store %arg14[%c0_128, %c0_129], %209 {strides = array<i32>} : memref<8x32xf32, #tpu.memory_space<vmem>>, vector<8x32xf32>,
    %c0_130 = arith.constant 0 : index
    %c0_131 = arith.constant 0 : index
    %211 = vector.load %arg15[%c0_130, %c0_131] : memref<8x32xf32, #tpu.memory_space<vmem>>, vector<8x32xf32>
    tpu.vector_store %arg15[%c0_130, %c0_131], %207 {strides = array<i32>} : memref<8x32xf32, #tpu.memory_space<vmem>>, vector<8x32xf32>,
    %212 = arith.index_cast %c6_i32 : i32 to index
    %c0_132 = arith.constant 0 : index
    %c0_133 = arith.constant 0 : index
    %213 = vector.load %arg12[%212, %c0_132, %c0_133] : memref<8x8x32xf32, #tpu.memory_space<vmem>>, vector<1x8x32xf32>
    %214 = vector.shape_cast %213 : vector<1x8x32xf32> to vector<8x32xf32>
    %215 = vector.shape_cast %209 : vector<8x32xf32> to vector<1x8x32xf32>
    tpu.vector_store %arg12[%212, %c0_132, %c0_133], %215 {strides = array<i32>} : memref<8x8x32xf32, #tpu.memory_space<vmem>>, vector<1x8x32xf32>,
    %c7_i32 = arith.constant 7 : i32
    %c0_134 = arith.constant 0 : index
    %c0_135 = arith.constant 0 : index
    %216 = vector.load %arg14[%c0_134, %c0_135] : memref<8x32xf32, #tpu.memory_space<vmem>>, vector<8x32xf32>
    %c0_136 = arith.constant 0 : index
    %c0_137 = arith.constant 0 : index
    %217 = vector.load %arg15[%c0_136, %c0_137] : memref<8x32xf32, #tpu.memory_space<vmem>>, vector<8x32xf32>
    %218 = arith.index_cast %c7_i32 : i32 to index
    %c0_138 = arith.constant 0 : index
    %c0_139 = arith.constant 0 : index
    %219 = vector.load %arg13[%218, %c0_138, %c0_139] : memref<8x8x128xf32, #tpu.memory_space<vmem>>, vector<1x8x128xf32>
    %220 = vector.shape_cast %219 : vector<1x8x128xf32> to vector<8x128xf32>
    %c0_140 = arith.constant 0 : index
    %c0_141 = arith.constant 0 : index
    %221 = vector.load %arg2[%c0_140, %c0_141] : memref<32x128xf32, #tpu.memory_space<vmem>>, vector<32x128xf32>
    %cst_142 = arith.constant dense<0.000000e+00> : vector<8x128xf32>
    %222 = tpu.matmul %216, %221, %cst_142 {dimension_numbers = #tpu.dot_dimension_numbers<[1], [0], [0], [1], [0, 0, 1, 1], [], []>} : vector<8x32xf32>, vector<32x128xf32>, vector<8x128xf32> -> vector<8x128xf32>
    %223 = arith.addf %220, %222 : vector<8x128xf32>
    %224 = math.tanh %223 : vector<8x128xf32>
    %225 = vector.extract_strided_slice %224 {offsets = [0, 0], sizes = [8, 96], strides = [1, 1]} : vector<8x128xf32> to vector<8x96xf32>
    %cst_143 = arith.constant 5.000000e-01 : f32
    %226 = vector.broadcast %cst_143 : f32 to vector<8x96xf32>
    %227 = arith.mulf %225, %226 : vector<8x96xf32>
    %cst_144 = arith.constant 5.000000e-01 : f32
    %228 = vector.broadcast %cst_144 : f32 to vector<8x96xf32>
    %229 = arith.addf %227, %228 : vector<8x96xf32>
    %230 = vector.extract_strided_slice %229 {offsets = [0, 0], sizes = [8, 32], strides = [1, 1]} : vector<8x96xf32> to vector<8x32xf32>
    %231 = vector.extract_strided_slice %229 {offsets = [0, 32], sizes = [8, 32], strides = [1, 1]} : vector<8x96xf32> to vector<8x32xf32>
    %232 = vector.extract_strided_slice %229 {offsets = [0, 64], sizes = [8, 32], strides = [1, 1]} : vector<8x96xf32> to vector<8x32xf32>
    %233 = vector.extract_strided_slice %224 {offsets = [0, 96], sizes = [8, 32], strides = [1, 1]} : vector<8x128xf32> to vector<8x32xf32>
    %234 = arith.mulf %231, %217 : vector<8x32xf32>
    %235 = arith.mulf %230, %233 : vector<8x32xf32>
    %236 = arith.addf %234, %235 : vector<8x32xf32>
    %237 = math.tanh %236 : vector<8x32xf32>
    %238 = arith.mulf %232, %237 : vector<8x32xf32>
    %c0_145 = arith.constant 0 : index
    %c0_146 = arith.constant 0 : index
    %239 = vector.load %arg14[%c0_145, %c0_146] : memref<8x32xf32, #tpu.memory_space<vmem>>, vector<8x32xf32>
    tpu.vector_store %arg14[%c0_145, %c0_146], %238 {strides = array<i32>} : memref<8x32xf32, #tpu.memory_space<vmem>>, vector<8x32xf32>,
    %c0_147 = arith.constant 0 : index
    %c0_148 = arith.constant 0 : index
    %240 = vector.load %arg15[%c0_147, %c0_148] : memref<8x32xf32, #tpu.memory_space<vmem>>, vector<8x32xf32>
    tpu.vector_store %arg15[%c0_147, %c0_148], %236 {strides = array<i32>} : memref<8x32xf32, #tpu.memory_space<vmem>>, vector<8x32xf32>,
    %241 = arith.index_cast %c7_i32 : i32 to index
    %c0_149 = arith.constant 0 : index
    %c0_150 = arith.constant 0 : index
    %242 = vector.load %arg12[%241, %c0_149, %c0_150] : memref<8x8x32xf32, #tpu.memory_space<vmem>>, vector<1x8x32xf32>
    %243 = vector.shape_cast %242 : vector<1x8x32xf32> to vector<8x32xf32>
    %244 = vector.shape_cast %238 : vector<8x32xf32> to vector<1x8x32xf32>
    tpu.vector_store %arg12[%241, %c0_149, %c0_150], %244 {strides = array<i32>} : memref<8x8x32xf32, #tpu.memory_space<vmem>>, vector<1x8x32xf32>,
    %c8_i32 = arith.constant 8 : i32
    %c0_151 = arith.constant 0 : index
    %c0_152 = arith.constant 0 : index
    %c0_153 = arith.constant 0 : index
    %245 = vector.load %arg12[%c0_151, %c0_152, %c0_153] : memref<8x8x32xf32, #tpu.memory_space<vmem>>, vector<8x8x32xf32>
    %246 = vector.shape_cast %245 : vector<8x8x32xf32> to vector<64x32xf32>
    %c0_154 = arith.constant 0 : index
    %c0_155 = arith.constant 0 : index
    %247 = vector.load %arg4[%c0_154, %c0_155] : memref<32x128xf32, #tpu.memory_space<vmem>>, vector<32x128xf32>
    %cst_156 = arith.constant dense<0.000000e+00> : vector<64x128xf32>
    %248 = tpu.matmul %246, %247, %cst_156 {dimension_numbers = #tpu.dot_dimension_numbers<[1], [0], [0], [1], [0, 0, 1, 1], [], []>} : vector<64x32xf32>, vector<32x128xf32>, vector<64x128xf32> -> vector<64x128xf32>
    %c0_157 = arith.constant 0 : index
    %c0_158 = arith.constant 0 : index
    %249 = vector.load %arg6[%c0_157, %c0_158] : memref<1x128xf32, #tpu.memory_space<vmem>>, vector<1x128xf32>
    %250 = vector.broadcast %249 : vector<1x128xf32> to vector<64x128xf32>
    %251 = arith.addf %248, %250 : vector<64x128xf32>
    %252 = vector.shape_cast %251 : vector<64x128xf32> to vector<8x8x128xf32>
    %c0_159 = arith.constant 0 : index
    %c0_160 = arith.constant 0 : index
    %c0_161 = arith.constant 0 : index
    %253 = vector.load %arg13[%c0_159, %c0_160, %c0_161] : memref<8x8x128xf32, #tpu.memory_space<vmem>>, vector<8x8x128xf32>
    tpu.vector_store %arg13[%c0_159, %c0_160, %c0_161], %252 {strides = array<i32>} : memref<8x8x128xf32, #tpu.memory_space<vmem>>, vector<8x8x128xf32>,
    %cst_162 = arith.constant 0.000000e+00 : f32
    %254 = vector.broadcast %cst_162 : f32 to vector<8x32xf32>
    %c0_163 = arith.constant 0 : index
    %c0_164 = arith.constant 0 : index
    %255 = vector.load %arg14[%c0_163, %c0_164] : memref<8x32xf32, #tpu.memory_space<vmem>>, vector<8x32xf32>
    tpu.vector_store %arg14[%c0_163, %c0_164], %254 {strides = array<i32>} : memref<8x32xf32, #tpu.memory_space<vmem>>, vector<8x32xf32>,
    %cst_165 = arith.constant 0.000000e+00 : f32
    %256 = vector.broadcast %cst_165 : f32 to vector<8x32xf32>
    %c0_166 = arith.constant 0 : index
    %c0_167 = arith.constant 0 : index
    %257 = vector.load %arg15[%c0_166, %c0_167] : memref<8x32xf32, #tpu.memory_space<vmem>>, vector<8x32xf32>
    tpu.vector_store %arg15[%c0_166, %c0_167], %256 {strides = array<i32>} : memref<8x32xf32, #tpu.memory_space<vmem>>, vector<8x32xf32>,
    %c0_i32_168 = arith.constant 0 : i32
    %c0_169 = arith.constant 0 : index
    %c0_170 = arith.constant 0 : index
    %258 = vector.load %arg14[%c0_169, %c0_170] : memref<8x32xf32, #tpu.memory_space<vmem>>, vector<8x32xf32>
    %c0_171 = arith.constant 0 : index
    %c0_172 = arith.constant 0 : index
    %259 = vector.load %arg15[%c0_171, %c0_172] : memref<8x32xf32, #tpu.memory_space<vmem>>, vector<8x32xf32>
    %260 = arith.index_cast %c0_i32_168 : i32 to index
    %c0_173 = arith.constant 0 : index
    %c0_174 = arith.constant 0 : index
    %261 = vector.load %arg13[%260, %c0_173, %c0_174] : memref<8x8x128xf32, #tpu.memory_space<vmem>>, vector<1x8x128xf32>
    %262 = vector.shape_cast %261 : vector<1x8x128xf32> to vector<8x128xf32>
    %c0_175 = arith.constant 0 : index
    %c0_176 = arith.constant 0 : index
    %263 = vector.load %arg5[%c0_175, %c0_176] : memref<32x128xf32, #tpu.memory_space<vmem>>, vector<32x128xf32>
    %cst_177 = arith.constant dense<0.000000e+00> : vector<8x128xf32>
    %264 = tpu.matmul %258, %263, %cst_177 {dimension_numbers = #tpu.dot_dimension_numbers<[1], [0], [0], [1], [0, 0, 1, 1], [], []>} : vector<8x32xf32>, vector<32x128xf32>, vector<8x128xf32> -> vector<8x128xf32>
    %265 = arith.addf %262, %264 : vector<8x128xf32>
    %266 = math.tanh %265 : vector<8x128xf32>
    %267 = vector.extract_strided_slice %266 {offsets = [0, 0], sizes = [8, 96], strides = [1, 1]} : vector<8x128xf32> to vector<8x96xf32>
    %cst_178 = arith.constant 5.000000e-01 : f32
    %268 = vector.broadcast %cst_178 : f32 to vector<8x96xf32>
    %269 = arith.mulf %267, %268 : vector<8x96xf32>
    %cst_179 = arith.constant 5.000000e-01 : f32
    %270 = vector.broadcast %cst_179 : f32 to vector<8x96xf32>
    %271 = arith.addf %269, %270 : vector<8x96xf32>
    %272 = vector.extract_strided_slice %271 {offsets = [0, 0], sizes = [8, 32], strides = [1, 1]} : vector<8x96xf32> to vector<8x32xf32>
    %273 = vector.extract_strided_slice %271 {offsets = [0, 32], sizes = [8, 32], strides = [1, 1]} : vector<8x96xf32> to vector<8x32xf32>
    %274 = vector.extract_strided_slice %271 {offsets = [0, 64], sizes = [8, 32], strides = [1, 1]} : vector<8x96xf32> to vector<8x32xf32>
    %275 = vector.extract_strided_slice %266 {offsets = [0, 96], sizes = [8, 32], strides = [1, 1]} : vector<8x128xf32> to vector<8x32xf32>
    %276 = arith.mulf %273, %259 : vector<8x32xf32>
    %277 = arith.mulf %272, %275 : vector<8x32xf32>
    %278 = arith.addf %276, %277 : vector<8x32xf32>
    %279 = math.tanh %278 : vector<8x32xf32>
    %280 = arith.mulf %274, %279 : vector<8x32xf32>
    %c0_180 = arith.constant 0 : index
    %c0_181 = arith.constant 0 : index
    %281 = vector.load %arg14[%c0_180, %c0_181] : memref<8x32xf32, #tpu.memory_space<vmem>>, vector<8x32xf32>
    tpu.vector_store %arg14[%c0_180, %c0_181], %280 {strides = array<i32>} : memref<8x32xf32, #tpu.memory_space<vmem>>, vector<8x32xf32>,
    %c0_182 = arith.constant 0 : index
    %c0_183 = arith.constant 0 : index
    %282 = vector.load %arg15[%c0_182, %c0_183] : memref<8x32xf32, #tpu.memory_space<vmem>>, vector<8x32xf32>
    tpu.vector_store %arg15[%c0_182, %c0_183], %278 {strides = array<i32>} : memref<8x32xf32, #tpu.memory_space<vmem>>, vector<8x32xf32>,
    %283 = arith.index_cast %c0_i32_168 : i32 to index
    %c0_184 = arith.constant 0 : index
    %c0_185 = arith.constant 0 : index
    %284 = vector.load %arg12[%283, %c0_184, %c0_185] : memref<8x8x32xf32, #tpu.memory_space<vmem>>, vector<1x8x32xf32>
    %285 = vector.shape_cast %284 : vector<1x8x32xf32> to vector<8x32xf32>
    %286 = vector.shape_cast %280 : vector<8x32xf32> to vector<1x8x32xf32>
    tpu.vector_store %arg12[%283, %c0_184, %c0_185], %286 {strides = array<i32>} : memref<8x8x32xf32, #tpu.memory_space<vmem>>, vector<1x8x32xf32>,
    %c1_i32_186 = arith.constant 1 : i32
    %c0_187 = arith.constant 0 : index
    %c0_188 = arith.constant 0 : index
    %287 = vector.load %arg14[%c0_187, %c0_188] : memref<8x32xf32, #tpu.memory_space<vmem>>, vector<8x32xf32>
    %c0_189 = arith.constant 0 : index
    %c0_190 = arith.constant 0 : index
    %288 = vector.load %arg15[%c0_189, %c0_190] : memref<8x32xf32, #tpu.memory_space<vmem>>, vector<8x32xf32>
    %289 = arith.index_cast %c1_i32_186 : i32 to index
    %c0_191 = arith.constant 0 : index
    %c0_192 = arith.constant 0 : index
    %290 = vector.load %arg13[%289, %c0_191, %c0_192] : memref<8x8x128xf32, #tpu.memory_space<vmem>>, vector<1x8x128xf32>
    %291 = vector.shape_cast %290 : vector<1x8x128xf32> to vector<8x128xf32>
    %c0_193 = arith.constant 0 : index
    %c0_194 = arith.constant 0 : index
    %292 = vector.load %arg5[%c0_193, %c0_194] : memref<32x128xf32, #tpu.memory_space<vmem>>, vector<32x128xf32>
    %cst_195 = arith.constant dense<0.000000e+00> : vector<8x128xf32>
    %293 = tpu.matmul %287, %292, %cst_195 {dimension_numbers = #tpu.dot_dimension_numbers<[1], [0], [0], [1], [0, 0, 1, 1], [], []>} : vector<8x32xf32>, vector<32x128xf32>, vector<8x128xf32> -> vector<8x128xf32>
    %294 = arith.addf %291, %293 : vector<8x128xf32>
    %295 = math.tanh %294 : vector<8x128xf32>
    %296 = vector.extract_strided_slice %295 {offsets = [0, 0], sizes = [8, 96], strides = [1, 1]} : vector<8x128xf32> to vector<8x96xf32>
    %cst_196 = arith.constant 5.000000e-01 : f32
    %297 = vector.broadcast %cst_196 : f32 to vector<8x96xf32>
    %298 = arith.mulf %296, %297 : vector<8x96xf32>
    %cst_197 = arith.constant 5.000000e-01 : f32
    %299 = vector.broadcast %cst_197 : f32 to vector<8x96xf32>
    %300 = arith.addf %298, %299 : vector<8x96xf32>
    %301 = vector.extract_strided_slice %300 {offsets = [0, 0], sizes = [8, 32], strides = [1, 1]} : vector<8x96xf32> to vector<8x32xf32>
    %302 = vector.extract_strided_slice %300 {offsets = [0, 32], sizes = [8, 32], strides = [1, 1]} : vector<8x96xf32> to vector<8x32xf32>
    %303 = vector.extract_strided_slice %300 {offsets = [0, 64], sizes = [8, 32], strides = [1, 1]} : vector<8x96xf32> to vector<8x32xf32>
    %304 = vector.extract_strided_slice %295 {offsets = [0, 96], sizes = [8, 32], strides = [1, 1]} : vector<8x128xf32> to vector<8x32xf32>
    %305 = arith.mulf %302, %288 : vector<8x32xf32>
    %306 = arith.mulf %301, %304 : vector<8x32xf32>
    %307 = arith.addf %305, %306 : vector<8x32xf32>
    %308 = math.tanh %307 : vector<8x32xf32>
    %309 = arith.mulf %303, %308 : vector<8x32xf32>
    %c0_198 = arith.constant 0 : index
    %c0_199 = arith.constant 0 : index
    %310 = vector.load %arg14[%c0_198, %c0_199] : memref<8x32xf32, #tpu.memory_space<vmem>>, vector<8x32xf32>
    tpu.vector_store %arg14[%c0_198, %c0_199], %309 {strides = array<i32>} : memref<8x32xf32, #tpu.memory_space<vmem>>, vector<8x32xf32>,
    %c0_200 = arith.constant 0 : index
    %c0_201 = arith.constant 0 : index
    %311 = vector.load %arg15[%c0_200, %c0_201] : memref<8x32xf32, #tpu.memory_space<vmem>>, vector<8x32xf32>
    tpu.vector_store %arg15[%c0_200, %c0_201], %307 {strides = array<i32>} : memref<8x32xf32, #tpu.memory_space<vmem>>, vector<8x32xf32>,
    %312 = arith.index_cast %c1_i32_186 : i32 to index
    %c0_202 = arith.constant 0 : index
    %c0_203 = arith.constant 0 : index
    %313 = vector.load %arg12[%312, %c0_202, %c0_203] : memref<8x8x32xf32, #tpu.memory_space<vmem>>, vector<1x8x32xf32>
    %314 = vector.shape_cast %313 : vector<1x8x32xf32> to vector<8x32xf32>
    %315 = vector.shape_cast %309 : vector<8x32xf32> to vector<1x8x32xf32>
    tpu.vector_store %arg12[%312, %c0_202, %c0_203], %315 {strides = array<i32>} : memref<8x8x32xf32, #tpu.memory_space<vmem>>, vector<1x8x32xf32>,
    %c2_i32_204 = arith.constant 2 : i32
    %c0_205 = arith.constant 0 : index
    %c0_206 = arith.constant 0 : index
    %316 = vector.load %arg14[%c0_205, %c0_206] : memref<8x32xf32, #tpu.memory_space<vmem>>, vector<8x32xf32>
    %c0_207 = arith.constant 0 : index
    %c0_208 = arith.constant 0 : index
    %317 = vector.load %arg15[%c0_207, %c0_208] : memref<8x32xf32, #tpu.memory_space<vmem>>, vector<8x32xf32>
    %318 = arith.index_cast %c2_i32_204 : i32 to index
    %c0_209 = arith.constant 0 : index
    %c0_210 = arith.constant 0 : index
    %319 = vector.load %arg13[%318, %c0_209, %c0_210] : memref<8x8x128xf32, #tpu.memory_space<vmem>>, vector<1x8x128xf32>
    %320 = vector.shape_cast %319 : vector<1x8x128xf32> to vector<8x128xf32>
    %c0_211 = arith.constant 0 : index
    %c0_212 = arith.constant 0 : index
    %321 = vector.load %arg5[%c0_211, %c0_212] : memref<32x128xf32, #tpu.memory_space<vmem>>, vector<32x128xf32>
    %cst_213 = arith.constant dense<0.000000e+00> : vector<8x128xf32>
    %322 = tpu.matmul %316, %321, %cst_213 {dimension_numbers = #tpu.dot_dimension_numbers<[1], [0], [0], [1], [0, 0, 1, 1], [], []>} : vector<8x32xf32>, vector<32x128xf32>, vector<8x128xf32> -> vector<8x128xf32>
    %323 = arith.addf %320, %322 : vector<8x128xf32>
    %324 = math.tanh %323 : vector<8x128xf32>
    %325 = vector.extract_strided_slice %324 {offsets = [0, 0], sizes = [8, 96], strides = [1, 1]} : vector<8x128xf32> to vector<8x96xf32>
    %cst_214 = arith.constant 5.000000e-01 : f32
    %326 = vector.broadcast %cst_214 : f32 to vector<8x96xf32>
    %327 = arith.mulf %325, %326 : vector<8x96xf32>
    %cst_215 = arith.constant 5.000000e-01 : f32
    %328 = vector.broadcast %cst_215 : f32 to vector<8x96xf32>
    %329 = arith.addf %327, %328 : vector<8x96xf32>
    %330 = vector.extract_strided_slice %329 {offsets = [0, 0], sizes = [8, 32], strides = [1, 1]} : vector<8x96xf32> to vector<8x32xf32>
    %331 = vector.extract_strided_slice %329 {offsets = [0, 32], sizes = [8, 32], strides = [1, 1]} : vector<8x96xf32> to vector<8x32xf32>
    %332 = vector.extract_strided_slice %329 {offsets = [0, 64], sizes = [8, 32], strides = [1, 1]} : vector<8x96xf32> to vector<8x32xf32>
    %333 = vector.extract_strided_slice %324 {offsets = [0, 96], sizes = [8, 32], strides = [1, 1]} : vector<8x128xf32> to vector<8x32xf32>
    %334 = arith.mulf %331, %317 : vector<8x32xf32>
    %335 = arith.mulf %330, %333 : vector<8x32xf32>
    %336 = arith.addf %334, %335 : vector<8x32xf32>
    %337 = math.tanh %336 : vector<8x32xf32>
    %338 = arith.mulf %332, %337 : vector<8x32xf32>
    %c0_216 = arith.constant 0 : index
    %c0_217 = arith.constant 0 : index
    %339 = vector.load %arg14[%c0_216, %c0_217] : memref<8x32xf32, #tpu.memory_space<vmem>>, vector<8x32xf32>
    tpu.vector_store %arg14[%c0_216, %c0_217], %338 {strides = array<i32>} : memref<8x32xf32, #tpu.memory_space<vmem>>, vector<8x32xf32>,
    %c0_218 = arith.constant 0 : index
    %c0_219 = arith.constant 0 : index
    %340 = vector.load %arg15[%c0_218, %c0_219] : memref<8x32xf32, #tpu.memory_space<vmem>>, vector<8x32xf32>
    tpu.vector_store %arg15[%c0_218, %c0_219], %336 {strides = array<i32>} : memref<8x32xf32, #tpu.memory_space<vmem>>, vector<8x32xf32>,
    %341 = arith.index_cast %c2_i32_204 : i32 to index
    %c0_220 = arith.constant 0 : index
    %c0_221 = arith.constant 0 : index
    %342 = vector.load %arg12[%341, %c0_220, %c0_221] : memref<8x8x32xf32, #tpu.memory_space<vmem>>, vector<1x8x32xf32>
    %343 = vector.shape_cast %342 : vector<1x8x32xf32> to vector<8x32xf32>
    %344 = vector.shape_cast %338 : vector<8x32xf32> to vector<1x8x32xf32>
    tpu.vector_store %arg12[%341, %c0_220, %c0_221], %344 {strides = array<i32>} : memref<8x8x32xf32, #tpu.memory_space<vmem>>, vector<1x8x32xf32>,
    %c3_i32_222 = arith.constant 3 : i32
    %c0_223 = arith.constant 0 : index
    %c0_224 = arith.constant 0 : index
    %345 = vector.load %arg14[%c0_223, %c0_224] : memref<8x32xf32, #tpu.memory_space<vmem>>, vector<8x32xf32>
    %c0_225 = arith.constant 0 : index
    %c0_226 = arith.constant 0 : index
    %346 = vector.load %arg15[%c0_225, %c0_226] : memref<8x32xf32, #tpu.memory_space<vmem>>, vector<8x32xf32>
    %347 = arith.index_cast %c3_i32_222 : i32 to index
    %c0_227 = arith.constant 0 : index
    %c0_228 = arith.constant 0 : index
    %348 = vector.load %arg13[%347, %c0_227, %c0_228] : memref<8x8x128xf32, #tpu.memory_space<vmem>>, vector<1x8x128xf32>
    %349 = vector.shape_cast %348 : vector<1x8x128xf32> to vector<8x128xf32>
    %c0_229 = arith.constant 0 : index
    %c0_230 = arith.constant 0 : index
    %350 = vector.load %arg5[%c0_229, %c0_230] : memref<32x128xf32, #tpu.memory_space<vmem>>, vector<32x128xf32>
    %cst_231 = arith.constant dense<0.000000e+00> : vector<8x128xf32>
    %351 = tpu.matmul %345, %350, %cst_231 {dimension_numbers = #tpu.dot_dimension_numbers<[1], [0], [0], [1], [0, 0, 1, 1], [], []>} : vector<8x32xf32>, vector<32x128xf32>, vector<8x128xf32> -> vector<8x128xf32>
    %352 = arith.addf %349, %351 : vector<8x128xf32>
    %353 = math.tanh %352 : vector<8x128xf32>
    %354 = vector.extract_strided_slice %353 {offsets = [0, 0], sizes = [8, 96], strides = [1, 1]} : vector<8x128xf32> to vector<8x96xf32>
    %cst_232 = arith.constant 5.000000e-01 : f32
    %355 = vector.broadcast %cst_232 : f32 to vector<8x96xf32>
    %356 = arith.mulf %354, %355 : vector<8x96xf32>
    %cst_233 = arith.constant 5.000000e-01 : f32
    %357 = vector.broadcast %cst_233 : f32 to vector<8x96xf32>
    %358 = arith.addf %356, %357 : vector<8x96xf32>
    %359 = vector.extract_strided_slice %358 {offsets = [0, 0], sizes = [8, 32], strides = [1, 1]} : vector<8x96xf32> to vector<8x32xf32>
    %360 = vector.extract_strided_slice %358 {offsets = [0, 32], sizes = [8, 32], strides = [1, 1]} : vector<8x96xf32> to vector<8x32xf32>
    %361 = vector.extract_strided_slice %358 {offsets = [0, 64], sizes = [8, 32], strides = [1, 1]} : vector<8x96xf32> to vector<8x32xf32>
    %362 = vector.extract_strided_slice %353 {offsets = [0, 96], sizes = [8, 32], strides = [1, 1]} : vector<8x128xf32> to vector<8x32xf32>
    %363 = arith.mulf %360, %346 : vector<8x32xf32>
    %364 = arith.mulf %359, %362 : vector<8x32xf32>
    %365 = arith.addf %363, %364 : vector<8x32xf32>
    %366 = math.tanh %365 : vector<8x32xf32>
    %367 = arith.mulf %361, %366 : vector<8x32xf32>
    %c0_234 = arith.constant 0 : index
    %c0_235 = arith.constant 0 : index
    %368 = vector.load %arg14[%c0_234, %c0_235] : memref<8x32xf32, #tpu.memory_space<vmem>>, vector<8x32xf32>
    tpu.vector_store %arg14[%c0_234, %c0_235], %367 {strides = array<i32>} : memref<8x32xf32, #tpu.memory_space<vmem>>, vector<8x32xf32>,
    %c0_236 = arith.constant 0 : index
    %c0_237 = arith.constant 0 : index
    %369 = vector.load %arg15[%c0_236, %c0_237] : memref<8x32xf32, #tpu.memory_space<vmem>>, vector<8x32xf32>
    tpu.vector_store %arg15[%c0_236, %c0_237], %365 {strides = array<i32>} : memref<8x32xf32, #tpu.memory_space<vmem>>, vector<8x32xf32>,
    %370 = arith.index_cast %c3_i32_222 : i32 to index
    %c0_238 = arith.constant 0 : index
    %c0_239 = arith.constant 0 : index
    %371 = vector.load %arg12[%370, %c0_238, %c0_239] : memref<8x8x32xf32, #tpu.memory_space<vmem>>, vector<1x8x32xf32>
    %372 = vector.shape_cast %371 : vector<1x8x32xf32> to vector<8x32xf32>
    %373 = vector.shape_cast %367 : vector<8x32xf32> to vector<1x8x32xf32>
    tpu.vector_store %arg12[%370, %c0_238, %c0_239], %373 {strides = array<i32>} : memref<8x8x32xf32, #tpu.memory_space<vmem>>, vector<1x8x32xf32>,
    %c4_i32_240 = arith.constant 4 : i32
    %c0_241 = arith.constant 0 : index
    %c0_242 = arith.constant 0 : index
    %374 = vector.load %arg14[%c0_241, %c0_242] : memref<8x32xf32, #tpu.memory_space<vmem>>, vector<8x32xf32>
    %c0_243 = arith.constant 0 : index
    %c0_244 = arith.constant 0 : index
    %375 = vector.load %arg15[%c0_243, %c0_244] : memref<8x32xf32, #tpu.memory_space<vmem>>, vector<8x32xf32>
    %376 = arith.index_cast %c4_i32_240 : i32 to index
    %c0_245 = arith.constant 0 : index
    %c0_246 = arith.constant 0 : index
    %377 = vector.load %arg13[%376, %c0_245, %c0_246] : memref<8x8x128xf32, #tpu.memory_space<vmem>>, vector<1x8x128xf32>
    %378 = vector.shape_cast %377 : vector<1x8x128xf32> to vector<8x128xf32>
    %c0_247 = arith.constant 0 : index
    %c0_248 = arith.constant 0 : index
    %379 = vector.load %arg5[%c0_247, %c0_248] : memref<32x128xf32, #tpu.memory_space<vmem>>, vector<32x128xf32>
    %cst_249 = arith.constant dense<0.000000e+00> : vector<8x128xf32>
    %380 = tpu.matmul %374, %379, %cst_249 {dimension_numbers = #tpu.dot_dimension_numbers<[1], [0], [0], [1], [0, 0, 1, 1], [], []>} : vector<8x32xf32>, vector<32x128xf32>, vector<8x128xf32> -> vector<8x128xf32>
    %381 = arith.addf %378, %380 : vector<8x128xf32>
    %382 = math.tanh %381 : vector<8x128xf32>
    %383 = vector.extract_strided_slice %382 {offsets = [0, 0], sizes = [8, 96], strides = [1, 1]} : vector<8x128xf32> to vector<8x96xf32>
    %cst_250 = arith.constant 5.000000e-01 : f32
    %384 = vector.broadcast %cst_250 : f32 to vector<8x96xf32>
    %385 = arith.mulf %383, %384 : vector<8x96xf32>
    %cst_251 = arith.constant 5.000000e-01 : f32
    %386 = vector.broadcast %cst_251 : f32 to vector<8x96xf32>
    %387 = arith.addf %385, %386 : vector<8x96xf32>
    %388 = vector.extract_strided_slice %387 {offsets = [0, 0], sizes = [8, 32], strides = [1, 1]} : vector<8x96xf32> to vector<8x32xf32>
    %389 = vector.extract_strided_slice %387 {offsets = [0, 32], sizes = [8, 32], strides = [1, 1]} : vector<8x96xf32> to vector<8x32xf32>
    %390 = vector.extract_strided_slice %387 {offsets = [0, 64], sizes = [8, 32], strides = [1, 1]} : vector<8x96xf32> to vector<8x32xf32>
    %391 = vector.extract_strided_slice %382 {offsets = [0, 96], sizes = [8, 32], strides = [1, 1]} : vector<8x128xf32> to vector<8x32xf32>
    %392 = arith.mulf %389, %375 : vector<8x32xf32>
    %393 = arith.mulf %388, %391 : vector<8x32xf32>
    %394 = arith.addf %392, %393 : vector<8x32xf32>
    %395 = math.tanh %394 : vector<8x32xf32>
    %396 = arith.mulf %390, %395 : vector<8x32xf32>
    %c0_252 = arith.constant 0 : index
    %c0_253 = arith.constant 0 : index
    %397 = vector.load %arg14[%c0_252, %c0_253] : memref<8x32xf32, #tpu.memory_space<vmem>>, vector<8x32xf32>
    tpu.vector_store %arg14[%c0_252, %c0_253], %396 {strides = array<i32>} : memref<8x32xf32, #tpu.memory_space<vmem>>, vector<8x32xf32>,
    %c0_254 = arith.constant 0 : index
    %c0_255 = arith.constant 0 : index
    %398 = vector.load %arg15[%c0_254, %c0_255] : memref<8x32xf32, #tpu.memory_space<vmem>>, vector<8x32xf32>
    tpu.vector_store %arg15[%c0_254, %c0_255], %394 {strides = array<i32>} : memref<8x32xf32, #tpu.memory_space<vmem>>, vector<8x32xf32>,
    %399 = arith.index_cast %c4_i32_240 : i32 to index
    %c0_256 = arith.constant 0 : index
    %c0_257 = arith.constant 0 : index
    %400 = vector.load %arg12[%399, %c0_256, %c0_257] : memref<8x8x32xf32, #tpu.memory_space<vmem>>, vector<1x8x32xf32>
    %401 = vector.shape_cast %400 : vector<1x8x32xf32> to vector<8x32xf32>
    %402 = vector.shape_cast %396 : vector<8x32xf32> to vector<1x8x32xf32>
    tpu.vector_store %arg12[%399, %c0_256, %c0_257], %402 {strides = array<i32>} : memref<8x8x32xf32, #tpu.memory_space<vmem>>, vector<1x8x32xf32>,
    %c5_i32_258 = arith.constant 5 : i32
    %c0_259 = arith.constant 0 : index
    %c0_260 = arith.constant 0 : index
    %403 = vector.load %arg14[%c0_259, %c0_260] : memref<8x32xf32, #tpu.memory_space<vmem>>, vector<8x32xf32>
    %c0_261 = arith.constant 0 : index
    %c0_262 = arith.constant 0 : index
    %404 = vector.load %arg15[%c0_261, %c0_262] : memref<8x32xf32, #tpu.memory_space<vmem>>, vector<8x32xf32>
    %405 = arith.index_cast %c5_i32_258 : i32 to index
    %c0_263 = arith.constant 0 : index
    %c0_264 = arith.constant 0 : index
    %406 = vector.load %arg13[%405, %c0_263, %c0_264] : memref<8x8x128xf32, #tpu.memory_space<vmem>>, vector<1x8x128xf32>
    %407 = vector.shape_cast %406 : vector<1x8x128xf32> to vector<8x128xf32>
    %c0_265 = arith.constant 0 : index
    %c0_266 = arith.constant 0 : index
    %408 = vector.load %arg5[%c0_265, %c0_266] : memref<32x128xf32, #tpu.memory_space<vmem>>, vector<32x128xf32>
    %cst_267 = arith.constant dense<0.000000e+00> : vector<8x128xf32>
    %409 = tpu.matmul %403, %408, %cst_267 {dimension_numbers = #tpu.dot_dimension_numbers<[1], [0], [0], [1], [0, 0, 1, 1], [], []>} : vector<8x32xf32>, vector<32x128xf32>, vector<8x128xf32> -> vector<8x128xf32>
    %410 = arith.addf %407, %409 : vector<8x128xf32>
    %411 = math.tanh %410 : vector<8x128xf32>
    %412 = vector.extract_strided_slice %411 {offsets = [0, 0], sizes = [8, 96], strides = [1, 1]} : vector<8x128xf32> to vector<8x96xf32>
    %cst_268 = arith.constant 5.000000e-01 : f32
    %413 = vector.broadcast %cst_268 : f32 to vector<8x96xf32>
    %414 = arith.mulf %412, %413 : vector<8x96xf32>
    %cst_269 = arith.constant 5.000000e-01 : f32
    %415 = vector.broadcast %cst_269 : f32 to vector<8x96xf32>
    %416 = arith.addf %414, %415 : vector<8x96xf32>
    %417 = vector.extract_strided_slice %416 {offsets = [0, 0], sizes = [8, 32], strides = [1, 1]} : vector<8x96xf32> to vector<8x32xf32>
    %418 = vector.extract_strided_slice %416 {offsets = [0, 32], sizes = [8, 32], strides = [1, 1]} : vector<8x96xf32> to vector<8x32xf32>
    %419 = vector.extract_strided_slice %416 {offsets = [0, 64], sizes = [8, 32], strides = [1, 1]} : vector<8x96xf32> to vector<8x32xf32>
    %420 = vector.extract_strided_slice %411 {offsets = [0, 96], sizes = [8, 32], strides = [1, 1]} : vector<8x128xf32> to vector<8x32xf32>
    %421 = arith.mulf %418, %404 : vector<8x32xf32>
    %422 = arith.mulf %417, %420 : vector<8x32xf32>
    %423 = arith.addf %421, %422 : vector<8x32xf32>
    %424 = math.tanh %423 : vector<8x32xf32>
    %425 = arith.mulf %419, %424 : vector<8x32xf32>
    %c0_270 = arith.constant 0 : index
    %c0_271 = arith.constant 0 : index
    %426 = vector.load %arg14[%c0_270, %c0_271] : memref<8x32xf32, #tpu.memory_space<vmem>>, vector<8x32xf32>
    tpu.vector_store %arg14[%c0_270, %c0_271], %425 {strides = array<i32>} : memref<8x32xf32, #tpu.memory_space<vmem>>, vector<8x32xf32>,
    %c0_272 = arith.constant 0 : index
    %c0_273 = arith.constant 0 : index
    %427 = vector.load %arg15[%c0_272, %c0_273] : memref<8x32xf32, #tpu.memory_space<vmem>>, vector<8x32xf32>
    tpu.vector_store %arg15[%c0_272, %c0_273], %423 {strides = array<i32>} : memref<8x32xf32, #tpu.memory_space<vmem>>, vector<8x32xf32>,
    %428 = arith.index_cast %c5_i32_258 : i32 to index
    %c0_274 = arith.constant 0 : index
    %c0_275 = arith.constant 0 : index
    %429 = vector.load %arg12[%428, %c0_274, %c0_275] : memref<8x8x32xf32, #tpu.memory_space<vmem>>, vector<1x8x32xf32>
    %430 = vector.shape_cast %429 : vector<1x8x32xf32> to vector<8x32xf32>
    %431 = vector.shape_cast %425 : vector<8x32xf32> to vector<1x8x32xf32>
    tpu.vector_store %arg12[%428, %c0_274, %c0_275], %431 {strides = array<i32>} : memref<8x8x32xf32, #tpu.memory_space<vmem>>, vector<1x8x32xf32>,
    %c6_i32_276 = arith.constant 6 : i32
    %c0_277 = arith.constant 0 : index
    %c0_278 = arith.constant 0 : index
    %432 = vector.load %arg14[%c0_277, %c0_278] : memref<8x32xf32, #tpu.memory_space<vmem>>, vector<8x32xf32>
    %c0_279 = arith.constant 0 : index
    %c0_280 = arith.constant 0 : index
    %433 = vector.load %arg15[%c0_279, %c0_280] : memref<8x32xf32, #tpu.memory_space<vmem>>, vector<8x32xf32>
    %434 = arith.index_cast %c6_i32_276 : i32 to index
    %c0_281 = arith.constant 0 : index
    %c0_282 = arith.constant 0 : index
    %435 = vector.load %arg13[%434, %c0_281, %c0_282] : memref<8x8x128xf32, #tpu.memory_space<vmem>>, vector<1x8x128xf32>
    %436 = vector.shape_cast %435 : vector<1x8x128xf32> to vector<8x128xf32>
    %c0_283 = arith.constant 0 : index
    %c0_284 = arith.constant 0 : index
    %437 = vector.load %arg5[%c0_283, %c0_284] : memref<32x128xf32, #tpu.memory_space<vmem>>, vector<32x128xf32>
    %cst_285 = arith.constant dense<0.000000e+00> : vector<8x128xf32>
    %438 = tpu.matmul %432, %437, %cst_285 {dimension_numbers = #tpu.dot_dimension_numbers<[1], [0], [0], [1], [0, 0, 1, 1], [], []>} : vector<8x32xf32>, vector<32x128xf32>, vector<8x128xf32> -> vector<8x128xf32>
    %439 = arith.addf %436, %438 : vector<8x128xf32>
    %440 = math.tanh %439 : vector<8x128xf32>
    %441 = vector.extract_strided_slice %440 {offsets = [0, 0], sizes = [8, 96], strides = [1, 1]} : vector<8x128xf32> to vector<8x96xf32>
    %cst_286 = arith.constant 5.000000e-01 : f32
    %442 = vector.broadcast %cst_286 : f32 to vector<8x96xf32>
    %443 = arith.mulf %441, %442 : vector<8x96xf32>
    %cst_287 = arith.constant 5.000000e-01 : f32
    %444 = vector.broadcast %cst_287 : f32 to vector<8x96xf32>
    %445 = arith.addf %443, %444 : vector<8x96xf32>
    %446 = vector.extract_strided_slice %445 {offsets = [0, 0], sizes = [8, 32], strides = [1, 1]} : vector<8x96xf32> to vector<8x32xf32>
    %447 = vector.extract_strided_slice %445 {offsets = [0, 32], sizes = [8, 32], strides = [1, 1]} : vector<8x96xf32> to vector<8x32xf32>
    %448 = vector.extract_strided_slice %445 {offsets = [0, 64], sizes = [8, 32], strides = [1, 1]} : vector<8x96xf32> to vector<8x32xf32>
    %449 = vector.extract_strided_slice %440 {offsets = [0, 96], sizes = [8, 32], strides = [1, 1]} : vector<8x128xf32> to vector<8x32xf32>
    %450 = arith.mulf %447, %433 : vector<8x32xf32>
    %451 = arith.mulf %446, %449 : vector<8x32xf32>
    %452 = arith.addf %450, %451 : vector<8x32xf32>
    %453 = math.tanh %452 : vector<8x32xf32>
    %454 = arith.mulf %448, %453 : vector<8x32xf32>
    %c0_288 = arith.constant 0 : index
    %c0_289 = arith.constant 0 : index
    %455 = vector.load %arg14[%c0_288, %c0_289] : memref<8x32xf32, #tpu.memory_space<vmem>>, vector<8x32xf32>
    tpu.vector_store %arg14[%c0_288, %c0_289], %454 {strides = array<i32>} : memref<8x32xf32, #tpu.memory_space<vmem>>, vector<8x32xf32>,
    %c0_290 = arith.constant 0 : index
    %c0_291 = arith.constant 0 : index
    %456 = vector.load %arg15[%c0_290, %c0_291] : memref<8x32xf32, #tpu.memory_space<vmem>>, vector<8x32xf32>
    tpu.vector_store %arg15[%c0_290, %c0_291], %452 {strides = array<i32>} : memref<8x32xf32, #tpu.memory_space<vmem>>, vector<8x32xf32>,
    %457 = arith.index_cast %c6_i32_276 : i32 to index
    %c0_292 = arith.constant 0 : index
    %c0_293 = arith.constant 0 : index
    %458 = vector.load %arg12[%457, %c0_292, %c0_293] : memref<8x8x32xf32, #tpu.memory_space<vmem>>, vector<1x8x32xf32>
    %459 = vector.shape_cast %458 : vector<1x8x32xf32> to vector<8x32xf32>
    %460 = vector.shape_cast %454 : vector<8x32xf32> to vector<1x8x32xf32>
    tpu.vector_store %arg12[%457, %c0_292, %c0_293], %460 {strides = array<i32>} : memref<8x8x32xf32, #tpu.memory_space<vmem>>, vector<1x8x32xf32>,
    %c7_i32_294 = arith.constant 7 : i32
    %c0_295 = arith.constant 0 : index
    %c0_296 = arith.constant 0 : index
    %461 = vector.load %arg14[%c0_295, %c0_296] : memref<8x32xf32, #tpu.memory_space<vmem>>, vector<8x32xf32>
    %c0_297 = arith.constant 0 : index
    %c0_298 = arith.constant 0 : index
    %462 = vector.load %arg15[%c0_297, %c0_298] : memref<8x32xf32, #tpu.memory_space<vmem>>, vector<8x32xf32>
    %463 = arith.index_cast %c7_i32_294 : i32 to index
    %c0_299 = arith.constant 0 : index
    %c0_300 = arith.constant 0 : index
    %464 = vector.load %arg13[%463, %c0_299, %c0_300] : memref<8x8x128xf32, #tpu.memory_space<vmem>>, vector<1x8x128xf32>
    %465 = vector.shape_cast %464 : vector<1x8x128xf32> to vector<8x128xf32>
    %c0_301 = arith.constant 0 : index
    %c0_302 = arith.constant 0 : index
    %466 = vector.load %arg5[%c0_301, %c0_302] : memref<32x128xf32, #tpu.memory_space<vmem>>, vector<32x128xf32>
    %cst_303 = arith.constant dense<0.000000e+00> : vector<8x128xf32>
    %467 = tpu.matmul %461, %466, %cst_303 {dimension_numbers = #tpu.dot_dimension_numbers<[1], [0], [0], [1], [0, 0, 1, 1], [], []>} : vector<8x32xf32>, vector<32x128xf32>, vector<8x128xf32> -> vector<8x128xf32>
    %468 = arith.addf %465, %467 : vector<8x128xf32>
    %469 = math.tanh %468 : vector<8x128xf32>
    %470 = vector.extract_strided_slice %469 {offsets = [0, 0], sizes = [8, 96], strides = [1, 1]} : vector<8x128xf32> to vector<8x96xf32>
    %cst_304 = arith.constant 5.000000e-01 : f32
    %471 = vector.broadcast %cst_304 : f32 to vector<8x96xf32>
    %472 = arith.mulf %470, %471 : vector<8x96xf32>
    %cst_305 = arith.constant 5.000000e-01 : f32
    %473 = vector.broadcast %cst_305 : f32 to vector<8x96xf32>
    %474 = arith.addf %472, %473 : vector<8x96xf32>
    %475 = vector.extract_strided_slice %474 {offsets = [0, 0], sizes = [8, 32], strides = [1, 1]} : vector<8x96xf32> to vector<8x32xf32>
    %476 = vector.extract_strided_slice %474 {offsets = [0, 32], sizes = [8, 32], strides = [1, 1]} : vector<8x96xf32> to vector<8x32xf32>
    %477 = vector.extract_strided_slice %474 {offsets = [0, 64], sizes = [8, 32], strides = [1, 1]} : vector<8x96xf32> to vector<8x32xf32>
    %478 = vector.extract_strided_slice %469 {offsets = [0, 96], sizes = [8, 32], strides = [1, 1]} : vector<8x128xf32> to vector<8x32xf32>
    %479 = arith.mulf %476, %462 : vector<8x32xf32>
    %480 = arith.mulf %475, %478 : vector<8x32xf32>
    %481 = arith.addf %479, %480 : vector<8x32xf32>
    %482 = math.tanh %481 : vector<8x32xf32>
    %483 = arith.mulf %477, %482 : vector<8x32xf32>
    %c0_306 = arith.constant 0 : index
    %c0_307 = arith.constant 0 : index
    %484 = vector.load %arg14[%c0_306, %c0_307] : memref<8x32xf32, #tpu.memory_space<vmem>>, vector<8x32xf32>
    tpu.vector_store %arg14[%c0_306, %c0_307], %483 {strides = array<i32>} : memref<8x32xf32, #tpu.memory_space<vmem>>, vector<8x32xf32>,
    %c0_308 = arith.constant 0 : index
    %c0_309 = arith.constant 0 : index
    %485 = vector.load %arg15[%c0_308, %c0_309] : memref<8x32xf32, #tpu.memory_space<vmem>>, vector<8x32xf32>
    tpu.vector_store %arg15[%c0_308, %c0_309], %481 {strides = array<i32>} : memref<8x32xf32, #tpu.memory_space<vmem>>, vector<8x32xf32>,
    %486 = arith.index_cast %c7_i32_294 : i32 to index
    %c0_310 = arith.constant 0 : index
    %c0_311 = arith.constant 0 : index
    %487 = vector.load %arg12[%486, %c0_310, %c0_311] : memref<8x8x32xf32, #tpu.memory_space<vmem>>, vector<1x8x32xf32>
    %488 = vector.shape_cast %487 : vector<1x8x32xf32> to vector<8x32xf32>
    %489 = vector.shape_cast %483 : vector<8x32xf32> to vector<1x8x32xf32>
    tpu.vector_store %arg12[%486, %c0_310, %c0_311], %489 {strides = array<i32>} : memref<8x8x32xf32, #tpu.memory_space<vmem>>, vector<1x8x32xf32>,
    %c8_i32_312 = arith.constant 8 : i32
    %c0_313 = arith.constant 0 : index
    %c0_314 = arith.constant 0 : index
    %c0_315 = arith.constant 0 : index
    %490 = vector.load %arg12[%c0_313, %c0_314, %c0_315] : memref<8x8x32xf32, #tpu.memory_space<vmem>>, vector<8x8x32xf32>
    %491 = vector.extract_strided_slice %490 {offsets = [0, 1, 0], sizes = [8, 1, 32], strides = [1, 1, 1]} : vector<8x8x32xf32> to vector<8x1x32xf32>
    %492 = vector.shape_cast %491 : vector<8x1x32xf32> to vector<8x32xf32>
    %cst_316 = arith.constant 0.000000e+00 : f32
    %493 = vector.broadcast %cst_316 : f32 to vector<8x32xf32>
    %494 = arith.maximumf %492, %493 : vector<8x32xf32>
    %c0_317 = arith.constant 0 : index
    %c0_318 = arith.constant 0 : index
    %495 = vector.load %arg7[%c0_317, %c0_318] : memref<32x128xf32, #tpu.memory_space<vmem>>, vector<32x128xf32>
    %cst_319 = arith.constant dense<0.000000e+00> : vector<8x128xf32>
    %496 = tpu.matmul %494, %495, %cst_319 {dimension_numbers = #tpu.dot_dimension_numbers<[1], [0], [0], [1], [0, 0, 1, 1], [], []>} : vector<8x32xf32>, vector<32x128xf32>, vector<8x128xf32> -> vector<8x128xf32>
    %c0_320 = arith.constant 0 : index
    %c0_321 = arith.constant 0 : index
    %497 = vector.load %arg8[%c0_320, %c0_321] : memref<1x128xf32, #tpu.memory_space<vmem>>, vector<1x128xf32>
    %498 = vector.broadcast %497 : vector<1x128xf32> to vector<8x128xf32>
    %499 = arith.addf %496, %498 : vector<8x128xf32>
    %cst_322 = arith.constant 0.000000e+00 : f32
    %500 = vector.broadcast %cst_322 : f32 to vector<8x128xf32>
    %501 = arith.maximumf %499, %500 : vector<8x128xf32>
    %c0_323 = arith.constant 0 : index
    %c0_324 = arith.constant 0 : index
    %502 = vector.load %arg9[%c0_323, %c0_324] : memref<128x128xf32, #tpu.memory_space<vmem>>, vector<128x128xf32>
    %cst_325 = arith.constant dense<0.000000e+00> : vector<8x128xf32>
    %503 = tpu.matmul %501, %502, %cst_325 {dimension_numbers = #tpu.dot_dimension_numbers<[1], [0], [0], [1], [0, 0, 1, 1], [], []>} : vector<8x128xf32>, vector<128x128xf32>, vector<8x128xf32> -> vector<8x128xf32>
    %c0_326 = arith.constant 0 : index
    %c0_327 = arith.constant 0 : index
    %504 = vector.load %arg10[%c0_326, %c0_327] : memref<1x128xf32, #tpu.memory_space<vmem>>, vector<1x128xf32>
    %505 = vector.broadcast %504 : vector<1x128xf32> to vector<8x128xf32>
    %506 = arith.addf %503, %505 : vector<8x128xf32>
    %c0_328 = arith.constant 0 : index
    %c0_329 = arith.constant 0 : index
    %507 = vector.load %arg11[%c0_328, %c0_329] : memref<8x128xf32, #tpu.memory_space<vmem>>, vector<8x128xf32>
    tpu.vector_store %arg11[%c0_328, %c0_329], %506 {strides = array<i32>} : memref<8x128xf32, #tpu.memory_space<vmem>>, vector<8x128xf32>,
    return
  }
}

</mosaic_0001>

<bundles_post_ra>
// kernel: text_lstm_forward.1
= control target key start
LH: loop header
LB: loop body
LE: loop exit
PB: predicated region body
PF: predicated region fallthrough
CT: control target
= control target key end

     0   :  { %16 = vsyncpa [#allocation7], 0  ;;  %s3841_s0 = inlined_call_operand.vmem [shape: f32[8,8,16], index: 0, kind: input, shape index: {}]   ;;  %s3842_s1 = inlined_call_operand.hbm [shape: f32[16,128], index: 1, kind: input, shape index: {}]   ;;  %s3843_s2 = inlined_call_operand.vmem [shape: f32[32,128], index: 2, kind: input, shape index: {}]   ;;  %s3844_s3 = inlined_call_operand.vmem [shape: f32[1,128], index: 3, kind: input, shape index: {}]   ;;  %s3845_s4 = inlined_call_operand.vmem [shape: f32[32,128], index: 4, kind: input, shape index: {}]   ;;  %s3846_s5 = inlined_call_operand.vmem [shape: f32[32,128], index: 5, kind: input, shape index: {}]   ;;  %s3847_s6 = inlined_call_operand.vmem [shape: f32[1,128], index: 6, kind: input, shape index: {}]   ;;  %s3848_s7 = inlined_call_operand.hbm [shape: f32[32,128], index: 7, kind: input, shape index: {}]   ;;  %s3849_s8 = inlined_call_operand.hbm [shape: f32[1,128], index: 8, kind: input, shape index: {}]   ;;  %s3850_s9 = inlined_call_operand.hbm [shape: f32[128,128], index: 9, kind: input, shape index: {}]   ;;  %s3851_s10 = inlined_call_operand.hbm [shape: f32[1,128], index: 10, kind: input, shape index: {}]   ;;  %s3852_s11 = inlined_call_operand.vmem [shape: f32[8,128], index: 11, kind: output, shape index: {}]  }
   0x1   :  { %17 = vsyncpa [#allocation9], 0 }
   0x2   :  { %18 = vsyncpa [#allocation12], 0  ;;  %s3268_s17 = smov [#allocation8]   ;;  %s3269_s19 = smov [#allocation11]  }
   0x3   :  { %s48_s18 = sshll.u32 %s3268_s17, 4  ;;  %s70_s20 = sshll.u32 %s3269_s19, 4  ;;  %s49_s18 = int_to_ptr.vmem [resolvable:$true] %s48_s18  ;;  %s3341_s20 = int_to_ptr.vmem [resolvable:$true] %s70_s20 }
   0x4   :  { %s3152_s23 = scalar_lea.hbm %s3848_s7, 512 }
   0x5   :  { %p3153_p0 = scmp.ne.s32.totalorder %s3848_s7, %s3152_s23  ;;  %p3156_p1 = scmp.lt.u32.totalorder %s3152_s23, %s3848_s7 }
   0x7   :  { %p3158_p2 = pnand %p3156_p1, %p3153_p0 }
   0x9   :  { %3161 = shalt.err (!%p3158_p2)
}
   0xa   :  { %s3162_s28 = scalar_lea.vmem %s49_s18, 512  ;;  %p3167_p4 = scmp.lt.s32.totalorder %s49_s18, %s49_s18 }
   0xb   :  { %p3163_p3 = scmp.ne.s32.totalorder %s49_s18, %s3162_s28  ;;  %p3168_p5 = scmp.lt.s32.totalorder %s3162_s28, %s3162_s28 }
   0xd   :  { %p3169_p6 = por %p3168_p5, %p3167_p4 }
   0xf   :  { %p3170_p7 = pnand %p3169_p6, %p3163_p3 }
  0x11   :  { %3173 = shalt.err (!%p3170_p7)
}
  0x12   :  { %s3270_s29 = smov 128   ;;  %s3271_s30 = smov 8  }
  0x13   :  { %54 = dma.hbm_to_vmem [thread:$0]  %s3848_s7, 512, %s49_s18, [#allocation9], %s3270_s29, %s3270_s29, %s3271_s30  }
  0x14   :  { %s3174_s16 = scalar_lea.hbm %s3850_s9, 2048 }
  0x15   :  { %p3175_p8 = scmp.ne.s32.totalorder %s3850_s9, %s3174_s16  ;;  %p3178_p9 = scmp.lt.u32.totalorder %s3174_s16, %s3850_s9 }
  0x17   :  { %p3180_p10 = pnand %p3178_p9, %p3175_p8 }
  0x19   :  { %3183 = shalt.err (!%p3180_p10)
}
  0x1a   :  { %s3184_s23 = scalar_lea.vmem %s3341_s20, 2048  ;;  %p3189_p12 = scmp.lt.s32.totalorder %s3341_s20, %s3341_s20 }
  0x1b   :  { %p3185_p11 = scmp.ne.s32.totalorder %s3341_s20, %s3184_s23  ;;  %p3190_p13 = scmp.lt.s32.totalorder %s3184_s23, %s3184_s23 }
  0x1d   :  { %p3191_p0 = por %p3190_p13, %p3189_p12 }
  0x1f   :  { %p3192_p1 = pnand %p3191_p0, %p3185_p11 }
  0x21   :  { %3195 = shalt.err (!%p3192_p1)
}
  0x22   :  { %76 = dma.hbm_to_vmem [thread:$0]  %s3850_s9, 2048, %s3341_s20, [#allocation12], %s3270_s29, %s3270_s29, %s3271_s30  }
  0x23   :  { %s3272_s24 = smov [#allocation6]   ;;  %s3273_s26 = smov [#allocation10]  }
  0x24   :  { %s26_s25 = sshll.u32 %s3272_s24, 4  ;;  %s61_s27 = sshll.u32 %s3273_s26, 4  ;;  %s27_s25 = int_to_ptr.vmem [resolvable:$true] %s26_s25  ;;  %s62_s27 = int_to_ptr.vmem [resolvable:$true] %s61_s27 }
  0x25   :  { %s3196_s13 = scalar_lea.hbm %s3842_s1, 256 }
  0x26   :  { %p3197_p2 = scmp.ne.s32.totalorder %s3842_s1, %s3196_s13  ;;  %p3200_p3 = scmp.lt.u32.totalorder %s3196_s13, %s3842_s1 }
  0x28   :  { %p3202_p4 = pnand %p3200_p3, %p3197_p2 }
  0x2a   :  { %3205 = shalt.err (!%p3202_p4)
}
  0x2b   :  { %s3206_s9 = scalar_lea.vmem %s27_s25, 256  ;;  %p3211_p6 = scmp.lt.s32.totalorder %s27_s25, %s27_s25 }
  0x2c   :  { %p3207_p5 = scmp.ne.s32.totalorder %s27_s25, %s3206_s9  ;;  %p3212_p7 = scmp.lt.s32.totalorder %s3206_s9, %s3206_s9 }
  0x2e   :  { %p3213_p8 = por %p3212_p7, %p3211_p6 }
  0x30   :  { %p3214_p9 = pnand %p3213_p8, %p3207_p5 }
  0x32   :  { %3217 = shalt.err (!%p3214_p9)
}
  0x33   :  { %32 = dma.hbm_to_vmem [thread:$0]  %s3842_s1, 256, %s27_s25, [#allocation7], %s3270_s29, %s3270_s29, %s3271_s30  }
  0x34   :  { %s3218_s23 = scalar_lea.hbm %s3849_s8, 16 }
  0x35   :  { %p3219_p10 = scmp.ne.s32.totalorder %s3849_s8, %s3218_s23  ;;  %p3222_p11 = scmp.lt.u32.totalorder %s3218_s23, %s3849_s8 }
  0x37   :  { %p3224_p12 = pnand %p3222_p11, %p3219_p10 }
  0x39   :  { %3227 = shalt.err (!%p3224_p12)
}
  0x3a   :  { %s3228_s28 = scalar_lea.vmem %s62_s27, 16  ;;  %s3232_s12 = scalar_lea.vmem %s62_s27, 32 }
  0x3b   :  { %p3229_p13 = scmp.ne.s32.totalorder %s62_s27, %s3228_s28  ;;  %p3233_p0 = scmp.lt.s32.totalorder %s62_s27, %s62_s27 }
  0x3c   :  { %p3234_p1 = scmp.lt.s32.totalorder %s3232_s12, %s3228_s28 }
  0x3e   :  { %p3235_p2 = por %p3234_p1, %p3233_p0 }
  0x40   :  { %p3236_p3 = pnand %p3235_p2, %p3229_p13 }
  0x42   :  { %3239 = shalt.err (!%p3236_p3)
}
  0x43   :  { %64 = dma.hbm_to_vmem [thread:$0]  %s3849_s8, 16, %s62_s27, [#allocation9]  }
  0x44   :  { %s3274_s30 = smov [#allocation13]   ;;  %s3240_s15 = scalar_lea.hbm %s3851_s10, 16 }
  0x45   :  { %s83_s25 = sshll.u32 %s3274_s30, 4  ;;  %p3241_p4 = scmp.ne.s32.totalorder %s3851_s10, %s3240_s15  ;;  %s84_s25 = int_to_ptr.vmem [resolvable:$true] %s83_s25 }
  0x46   :  { %p3244_p5 = scmp.lt.u32.totalorder %s3240_s15, %s3851_s10 }
  0x48   :  { %p3246_p6 = pnand %p3244_p5, %p3241_p4 }
  0x4a   :  { %3249 = shalt.err (!%p3246_p6)
}
  0x4b   :  { %s3250_s19 = scalar_lea.vmem %s84_s25, 16  ;;  %s3254_s8 = scalar_lea.vmem %s84_s25, 32 }
  0x4c   :  { %p3251_p7 = scmp.ne.s32.totalorder %s84_s25, %s3250_s19  ;;  %p3255_p8 = scmp.lt.s32.totalorder %s84_s25, %s84_s25 }
  0x4d   :  { %p3256_p9 = scmp.lt.s32.totalorder %s3254_s8, %s3250_s19 }
  0x4f   :  { %p3257_p10 = por %p3256_p9, %p3255_p8 }
  0x51   :  { %p3258_p11 = pnand %p3257_p10, %p3251_p7 }
  0x53   :  { %3261 = shalt.err (!%p3258_p11)
}
  0x54   :  { %86 = dma.hbm_to_vmem [thread:$0]  %s3851_s10, 16, %s84_s25, [#allocation12]  }
  0x55   :  { %3262 = dma.done.wait [#allocation7], 256  }
  0x56   :  { %3263 = vsyncadd [#allocation7], 4294967040 }
  0x57   :  { %3264 = dma.done.wait [#allocation9], 528  }
  0x58   :  { %3265 = vsyncadd [#allocation9], 4294966768 }
  0x59   :  { %3266 = dma.done.wait [#allocation12], 2064  }
  0x5a   :  { %3267 = vsyncadd [#allocation12], 4294965232  ;;  %vm257_vm0 = vcmask 261120   ;;  %v3275_v0 = vmov 0.0|0.0   ;;  %vm3276_vm1 = vmmov 0   ;;  %v3277_v1 = vmov 0.0  }
  0x5b   :  { %2959 = vmatprep.subr.bf16.mxu1 %v3275_v0  ;;  %2736 = vmatprep.mubr.msk.f32.mxu1 %vm3276_vm1, %v3277_v1  ;;  %258 = vst.msk [vmem:[#allocation4] sm:$0xff] %vm257_vm0, %v3277_v1  ;;  %259 = vst.msk [vmem:[#allocation5] sm:$0xff] %vm257_vm0, %v3277_v1  ;;  %vm119_vm2 = vcmask 130048   ;;  %v110_v2 = vld [vmem:[#allocation6] sm:$0xff]  ;;  %v111_v3 = vld [vmem:[#allocation6 + $0x8] sm:$0xff]  ;;  %s3279_s10 = smov 96  }
  0x5c   :  { %v102_v4 = vld [vmem:[%s3841_s0] sm:$0xff]  ;;  %v2937_v5 = vpack.c.bf16 %v111_v3, %v110_v2  ;;  %v264_v7 = vld [vmem:[%s3843_s2 + $0x8] sm:$0xff]  ;;  %v265_v10 = vld [vmem:[%s3843_s2 + $0x10] sm:$0xff]  ;;  %s3280_s22 = smov 64   ;;  %vm2324_vm3 = vcmask 1041409   ;;  %vm2327_vm4 = vcmask 1042434  }
  0x5d   :  { %2683 = vmatprep.mubr.msk.f32.mxu0 %vm119_vm2, %v102_v4  ;;  %v263_v6 = vld [vmem:[%s3843_s2] sm:$0xff]  ;;  %v103_v9 = vld [vmem:[%s3841_s0 + $0x8] sm:$0xff]  ;;  %v266_v11 = vld [vmem:[%s3843_s2 + $0x18] sm:$0xff]  ;;  %vm2330_vm5 = vcmask 1043459   ;;  %vm2333_vm6 = vcmask 1044484   ;;  %vm2336_vm7 = vcmask 1045509  }
  0x5e   :  { %v3434_v8 = vpack.c.bf16 %v264_v7, %v263_v6  ;;  %2938 = vmatprep.subr.bf16.mxu0 %v2937_v5  ;;  %v104_v12 = vld [vmem:[%s3841_s0 + $0x10] sm:$0xff]  ;;  %v3452_v13 = vpack.c.bf16 %v266_v11, %v265_v10  ;;  %v105_v14 = vld [vmem:[%s3841_s0 + $0x18] sm:$0xff]  ;;  %v106_v15 = vld [vmem:[%s3841_s0 + $0x20] sm:$0xff]  ;;  %vm2339_vm8 = vcmask 1046534   ;;  %vm2342_vm9 = vcmask 1047559  }
  0x5f   :  { %2940 = vmatpush3.bf16.msra.mxu0 %v2937_v5  ;;  %v107_v16 = vld [vmem:[%s3841_s0 + $0x28] sm:$0xff]  ;;  %v108_v17 = vld [vmem:[%s3841_s0 + $0x30] sm:$0xff]  ;;  %v109_v18 = vld [vmem:[%s3841_s0 + $0x38] sm:$0xff] }
  0x60   :  { %2961 = vmatpush3.bf16.msra.mxu1 %v3434_v8  ;;  %2941 = vmatprep.subr.bf16.mxu0 %v3275_v0  ;;  %v2518_v20 = vld [vmem:[%s3844_s3] ss:$0 sm:$0xff]  ;;  %s3278_s3 = smov 32  }
  0x61   :  { %2962 = vmatprep.subr.bf16.mxu1 %v3275_v0 }
  0x62   :  { %2684 = vmatmul.mubr.msk.f32.vlgmr.msra.gmra.mrb[0].mxu0 %vm119_vm2, %v103_v9  ;;  %v260_v19 = vld [vmem:[#allocation4] sm:$0xff]  ;;  %v261_v41 = vld [vmem:[#allocation5] sm:$0xff] }
  0x63   :  { %2943 = vmatpush3.bf16.msra.mxu0 %v3434_v8  ;;  %2686 = vmatprep.mubr.msk.f32.mxu0 %vm119_vm2, %v104_v12 }
  0x64   :  { %2944 = vmatprep.subr.bf16.mxu0 %v3275_v0  ;;  %2964 = vmatpush3.bf16.msra.mxu1 %v3452_v13 }
  0x65   :  { %2971 = vmatprep.subr.bf16.mxu1 %v3275_v0 }
  0x66   :  { %2687 = vmatmul.mubr.msk.f32.gmra.mrb[2].mxu0 %vm119_vm2, %v105_v14 }
  0x67   :  { %2689 = vmatprep.mubr.msk.f32.mxu0 %vm119_vm2, %v106_v15  ;;  %2946 = vmatpush3.bf16.msra.mxu0 %v3452_v13 }
  0x68   :  { %2947 = vmatprep.subr.bf16.mxu0 %v3275_v0 }
  0x6a   :  { %2690 = vmatmul.mubr.msk.f32.gmra.mrb[4].mxu0 %vm119_vm2, %v107_v16 }
  0x6b   :  { %2692 = vmatprep.mubr.msk.f32.mxu0 %vm119_vm2, %v108_v17 }
  0x6e   :  { %2693 = vmatmul.mubr.msk.f32.gmra.mrb[6].mxu0 %vm119_vm2, %v109_v18 }
  0x6f   :  { %2703 = vmatprep.mubr.msk.f32.mxu0 %vm3276_vm1, %v3277_v1 }
  0x72   :  { %2704 = vmatmul.mubr.msk.f32.vlgmr.msra.gmra.mrb[8].mxu0 %vm257_vm0, %v260_v19 }
  0x73   :  { %2949 = vmatpush3.bf16.msra.mxu0 %v3434_v8  ;;  %2714 = vmatprep.mubr.msk.f32.mxu0 %vm3276_vm1, %v3277_v1 }
  0x74   :  { %2950 = vmatprep.subr.bf16.mxu0 %v3275_v0 }
  0x77   :  { %2952 = vmatpush3.bf16.msra.mxu0 %v3452_v13 }
  0x78   :  { %2953 = vmatprep.subr.bf16.mxu0 %v3275_v0 }
 0x135   :  { %v2685_v21 = vpop.f32.mrb[0].mxu0 }
 0x136   :  { %v216_v22 = vadd.f32 %v2685_v21, %v2518_v20  ;;  %v210_v23 = vpop.f32.mrb[1].mxu0 }
 0x137   :  { %v211_v36 = vadd.f32 %v2518_v20, %v210_v23 }
 0x139   :  { %v2688_v24 = vpop.f32.mrb[2].mxu0 }
 0x13a   :  { %v3493_v25 = vadd.f32 %v2688_v24, %v2518_v20  ;;  %v220_v26 = vpop.f32.mrb[3].mxu0 }
 0x13b   :  { %v3495_v27 = vadd.f32 %v2518_v20, %v220_v26 }
 0x13d   :  { %v2691_v28 = vpop.f32.mrb[4].mxu0 }
 0x13e   :  { %v3497_v29 = vadd.f32 %v2691_v28, %v2518_v20  ;;  %v230_v30 = vpop.f32.mrb[5].mxu0 }
 0x13f   :  { %v3499_v31 = vadd.f32 %v2518_v20, %v230_v30 }
 0x141   :  { %v2694_v32 = vpop.f32.mrb[6].mxu0 }
 0x142   :  { %v3501_v33 = vadd.f32 %v2694_v32, %v2518_v20  ;;  %v240_v34 = vpop.f32.mrb[7].mxu0 }
 0x143   :  { %v3503_v35 = vadd.f32 %v2518_v20, %v240_v34 }
 0x145   :  { %v336_v37 = vpop.f32.mrb[8].mxu0 }
 0x146   :  { %v340_v38 = vadd.f32 %v336_v37, %v211_v36  ;;  %v2705_v39 = vpop.f32.mrb[9].mxu0 }
 0x148   :  { %3088 = vtanh.f32 %v340_v38 }
 0x152   :  { %v3089_v40 = vpop.eup %3088 }
 0x153   :  { %350 = vrot.lane.b32.xlu0 %v3089_v40, %s3278_s3  ;;  %v342_v42 = vmul.f32 0.5, %v3089_v40 }
 0x155   :  { %v343_v43 = vadd.f32 0.5, %v342_v42 }
 0x157   :  { %345 = vrot.lane.b32.xlu0 %v261_v41, %s3278_s3 }
 0x1c5   :  { %v351_v44 = vpop.permute.xlu0 %350 }
 0x1c6   :  { %v353_v45 = vmul.f32 %v351_v44, %v343_v43 }
 0x1c8   :  { %355 = vrot.lane.b32.xlu1 %v353_v45, %s3278_s3 }
 0x1c9   :  { %v346_v46 = vpop.permute.xlu0 %345 }
 0x1ca   :  { %v348_v47 = vmul.f32 %v346_v46, %v343_v43 }
 0x23a   :  { %v356_v48 = vpop.permute.xlu1 %355 }
 0x23b   :  { %v358_v49 = vadd.f32 %v356_v48, %v348_v47 }
 0x23d   :  { %3090 = vtanh.f32 %v358_v49 }
 0x247   :  { %v3091_v50 = vpop.eup %3090 }
 0x248   :  { %361 = vrot.lane.b32.xlu1 %v3091_v50, %s3278_s3 }
 0x24c   :  { %371 = vrot.lane.b32.xlu1 %v358_v49, %s3279_s10 }
 0x2ba   :  { %v362_v51 = vpop.permute.xlu1 %361 }
 0x2bb   :  { %v364_v52 = vmul.f32 %v362_v51, %v343_v43 }
 0x2bd   :  { %366 = vrot.lane.b32.xlu0 %v364_v52, %s3280_s22 }
 0x2be   :  { %v372_v53 = vpop.permute.xlu1 %371 }
 0x2bf   :  { %374 = vst.msk [vmem:[#allocation5] sm:$0xff] %vm257_vm0, %v372_v53 }
 0x2c6   :  { %v377_v54 = vld [vmem:[#allocation5] sm:$0xff] }
 0x2c7   :  { %462 = vrot.lane.b32.xlu1 %v377_v54, %s3278_s3 }
 0x32f   :  { %v367_v55 = vpop.permute.xlu0 %366 }
 0x330   :  { %369 = vst.msk [vmem:[#allocation4] sm:$0xff] %vm257_vm0, %v367_v55  ;;  %375 = vst.msk [vmem:[#allocation2] sm:$0xff] %vm257_vm0, %v367_v55 }
 0x337   :  { %v376_v56 = vld [vmem:[#allocation4] sm:$0xff] }
 0x338   :  { %2715 = vmatmul.mubr.msk.f32.vlgmr.msra.gmra.mrb[10].mxu0 %vm257_vm0, %v376_v56 }
 0x339   :  { %2955 = vmatpush3.bf16.msra.mxu0 %v3434_v8  ;;  %2725 = vmatprep.mubr.msk.f32.mxu0 %vm3276_vm1, %v3277_v1  ;;  %v463_v3 = vpop.permute.xlu1 %462 }
 0x33a   :  { %2956 = vmatprep.subr.bf16.mxu0 %v3275_v0 }
 0x33d   :  { %2958 = vmatpush3.bf16.msra.mxu0 %v3452_v13 }
 0x33e   :  { %2965 = vmatprep.subr.bf16.mxu0 %v3275_v0 }
 0x40b   :  { %v453_v57 = vpop.f32.mrb[10].mxu0 }
 0x40c   :  { %v457_v58 = vadd.f32 %v453_v57, %v216_v22  ;;  %v2716_v59 = vpop.f32.mrb[11].mxu0 }
 0x40e   :  { %3092 = vtanh.f32 %v457_v58 }
 0x418   :  { %v3093_v60 = vpop.eup %3092 }
 0x419   :  { %467 = vrot.lane.b32.xlu0 %v3093_v60, %s3278_s3  ;;  %v459_v61 = vmul.f32 0.5, %v3093_v60 }
 0x41b   :  { %v460_v62 = vadd.f32 0.5, %v459_v61 }
 0x41d   :  { %v465_v4 = vmul.f32 %v463_v3, %v460_v62 }
 0x48b   :  { %v468_v63 = vpop.permute.xlu0 %467 }
 0x48c   :  { %v470_v2 = vmul.f32 %v468_v63, %v460_v62 }
 0x48e   :  { %472 = vrot.lane.b32.xlu0 %v470_v2, %s3278_s3 }
 0x500   :  { %v473_v5 = vpop.permute.xlu0 %472 }
 0x501   :  { %v475_v6 = vadd.f32 %v473_v5, %v465_v4 }
 0x503   :  { %3094 = vtanh.f32 %v475_v6 }
 0x50d   :  { %v3095_v7 = vpop.eup %3094 }
 0x50e   :  { %478 = vrot.lane.b32.xlu1 %v3095_v7, %s3278_s3 }
 0x512   :  { %488 = vrot.lane.b32.xlu1 %v475_v6, %s3279_s10 }
 0x580   :  { %v479_v9 = vpop.permute.xlu1 %478 }
 0x581   :  { %v481_v10 = vmul.f32 %v479_v9, %v460_v62 }
 0x583   :  { %483 = vrot.lane.b32.xlu0 %v481_v10, %s3280_s22 }
 0x584   :  { %v489_v11 = vpop.permute.xlu1 %488 }
 0x585   :  { %491 = vst.msk [vmem:[#allocation5] sm:$0xff] %vm257_vm0, %v489_v11 }
 0x58c   :  { %v495_v12 = vld [vmem:[#allocation5] sm:$0xff] }
 0x58d   :  { %580 = vrot.lane.b32.xlu1 %v495_v12, %s3278_s3 }
 0x5f5   :  { %v484_v14 = vpop.permute.xlu0 %483 }
 0x5f6   :  { %486 = vst.msk [vmem:[#allocation4] sm:$0xff] %vm257_vm0, %v484_v14  ;;  %493 = vst.msk [vmem:[#allocation2 + $0x8] sm:$0xff] %vm257_vm0, %v484_v14 }
 0x5fd   :  { %v494_v15 = vld [vmem:[#allocation4] sm:$0xff] }
 0x5fe   :  { %2726 = vmatmul.mubr.msk.f32.vlgmr.msra.gmra.mrb[12].mxu0 %vm257_vm0, %v494_v15 }
 0x5ff   :  { %2967 = vmatpush3.bf16.msra.mxu0 %v3434_v8  ;;  %2747 = vmatprep.mubr.msk.f32.mxu0 %vm3276_vm1, %v3277_v1  ;;  %v581_v24 = vpop.permute.xlu1 %580 }
 0x600   :  { %2968 = vmatprep.subr.bf16.mxu0 %v3275_v0 }
 0x603   :  { %2970 = vmatpush3.bf16.msra.mxu0 %v3452_v13 }
 0x604   :  { %2977 = vmatprep.subr.bf16.mxu0 %v3275_v0 }
 0x6d1   :  { %v571_v16 = vpop.f32.mrb[12].mxu0 }
 0x6d2   :  { %v575_v17 = vadd.f32 %v571_v16, %v3495_v27  ;;  %v2727_v18 = vpop.f32.mrb[13].mxu0 }
 0x6d4   :  { %3096 = vtanh.f32 %v575_v17 }
 0x6de   :  { %v3097_v19 = vpop.eup %3096 }
 0x6df   :  { %585 = vrot.lane.b32.xlu0 %v3097_v19, %s3278_s3  ;;  %v577_v20 = vmul.f32 0.5, %v3097_v19 }
 0x6e1   :  { %v578_v21 = vadd.f32 0.5, %v577_v20 }
 0x6e3   :  { %v583_v26 = vmul.f32 %v581_v24, %v578_v21 }
 0x751   :  { %v586_v22 = vpop.permute.xlu0 %585 }
 0x752   :  { %v588_v23 = vmul.f32 %v586_v22, %v578_v21 }
 0x754   :  { %590 = vrot.lane.b32.xlu0 %v588_v23, %s3278_s3 }
 0x7c6   :  { %v591_v28 = vpop.permute.xlu0 %590 }
 0x7c7   :  { %v593_v30 = vadd.f32 %v591_v28, %v583_v26 }
 0x7c9   :  { %3098 = vtanh.f32 %v593_v30 }
 0x7d3   :  { %v3099_v32 = vpop.eup %3098 }
 0x7d4   :  { %596 = vrot.lane.b32.xlu1 %v3099_v32, %s3278_s3 }
 0x7d8   :  { %606 = vrot.lane.b32.xlu1 %v593_v30, %s3279_s10  ;;  %v1211_v30 = vld [vmem:[%s3845_s4 + $0x8] sm:$0xff] }
 0x846   :  { %v597_v27 = vpop.permute.xlu1 %596 }
 0x847   :  { %v599_v34 = vmul.f32 %v597_v27, %v578_v21 }
 0x849   :  { %601 = vrot.lane.b32.xlu0 %v599_v34, %s3280_s22 }
 0x84a   :  { %v607_v36 = vpop.permute.xlu1 %606 }
 0x84b   :  { %609 = vst.msk [vmem:[#allocation5] sm:$0xff] %vm257_vm0, %v607_v36 }
 0x852   :  { %v613_v37 = vld [vmem:[#allocation5] sm:$0xff] }
 0x853   :  { %698 = vrot.lane.b32.xlu1 %v613_v37, %s3278_s3 }
 0x8bb   :  { %v602_v38 = vpop.permute.xlu0 %601 }
 0x8bc   :  { %604 = vst.msk [vmem:[#allocation4] sm:$0xff] %vm257_vm0, %v602_v38  ;;  %611 = vst.msk [vmem:[#allocation2 + $0x10] sm:$0xff] %vm257_vm0, %v602_v38 }
 0x8c3   :  { %v612_v39 = vld [vmem:[#allocation4] sm:$0xff] }
 0x8c4   :  { %2737 = vmatmul.mubr.msk.f32.vlgmr.msra.gmra.mrb[0].mxu1 %vm257_vm0, %v612_v39  ;;  %v1212_v39 = vld [vmem:[%s3845_s4 + $0x10] sm:$0xff] }
 0x8c5   :  { %2973 = vmatpush3.bf16.msra.mxu1 %v3434_v8  ;;  %2758 = vmatprep.mubr.msk.f32.mxu1 %vm3276_vm1, %v3277_v1  ;;  %v699_v48 = vpop.permute.xlu1 %698 }
 0x8c6   :  { %2974 = vmatprep.subr.bf16.mxu1 %v3275_v0 }
 0x8c9   :  { %2976 = vmatpush3.bf16.msra.mxu1 %v3452_v13 }
 0x8ca   :  { %2983 = vmatprep.subr.bf16.mxu1 %v3275_v0 }
 0x997   :  { %v689_v40 = vpop.f32.mrb[0].mxu1 }
 0x998   :  { %v693_v41 = vadd.f32 %v689_v40, %v3493_v25  ;;  %v2738_v42 = vpop.f32.mrb[1].mxu1  ;;  %v1213_v40 = vld [vmem:[%s3845_s4 + $0x18] sm:$0xff] }
 0x99a   :  { %3100 = vtanh.f32 %v693_v41  ;;  %v2993_v41 = vpack.c.bf16 %v1213_v40, %v1212_v39  ;;  %v3695_v39 = vld [vmem:[%s3847_s6] ss:$0 sm:$0xff] }
 0x9a4   :  { %v3101_v43 = vpop.eup %3100 }
 0x9a5   :  { %703 = vrot.lane.b32.xlu0 %v3101_v43, %s3278_s3  ;;  %v695_v44 = vmul.f32 0.5, %v3101_v43  ;;  %v1202_v43 = vld [vmem:[#allocation2] sm:$0xff] }
 0x9a7   :  { %v696_v45 = vadd.f32 0.5, %v695_v44  ;;  %v1203_v44 = vld [vmem:[#allocation2 + $0x8] sm:$0xff] }
 0x9a9   :  { %v701_v49 = vmul.f32 %v699_v48, %v696_v45 }
 0xa17   :  { %v704_v46 = vpop.permute.xlu0 %703 }
 0xa18   :  { %v706_v47 = vmul.f32 %v704_v46, %v696_v45 }
 0xa1a   :  { %708 = vrot.lane.b32.xlu0 %v706_v47, %s3278_s3 }
 0xa8c   :  { %v709_v50 = vpop.permute.xlu0 %708 }
 0xa8d   :  { %v711_v51 = vadd.f32 %v709_v50, %v701_v49 }
 0xa8f   :  { %3102 = vtanh.f32 %v711_v51 }
 0xa99   :  { %v3103_v52 = vpop.eup %3102 }
 0xa9a   :  { %714 = vrot.lane.b32.xlu1 %v3103_v52, %s3278_s3 }
 0xa9e   :  { %724 = vrot.lane.b32.xlu1 %v711_v51, %s3279_s10 }
 0xb0c   :  { %v715_v25 = vpop.permute.xlu1 %714 }
 0xb0d   :  { %v717_v53 = vmul.f32 %v715_v25, %v696_v45  ;;  %v1204_v45 = vld [vmem:[#allocation2 + $0x10] sm:$0xff] }
 0xb0f   :  { %719 = vrot.lane.b32.xlu0 %v717_v53, %s3280_s22 }
 0xb10   :  { %v725_v54 = vpop.permute.xlu1 %724 }
 0xb11   :  { %727 = vst.msk [vmem:[#allocation5] sm:$0xff] %vm257_vm0, %v725_v54 }
 0xb18   :  { %v731_v55 = vld [vmem:[#allocation5] sm:$0xff] }
 0xb19   :  { %816 = vrot.lane.b32.xlu1 %v731_v55, %s3278_s3 }
 0xb81   :  { %v720_v56 = vpop.permute.xlu0 %719 }
 0xb82   :  { %722 = vst.msk [vmem:[#allocation4] sm:$0xff] %vm257_vm0, %v720_v56  ;;  %729 = vst.msk [vmem:[#allocation2 + $0x18] sm:$0xff] %vm257_vm0, %v720_v56 }
 0xb89   :  { %v730_v57 = vld [vmem:[#allocation4] sm:$0xff]  ;;  %v1205_v46 = vld [vmem:[#allocation2 + $0x18] sm:$0xff] }
 0xb8a   :  { %2748 = vmatmul.mubr.msk.f32.vlgmr.msra.gmra.mrb[14].mxu0 %vm257_vm0, %v730_v57 }
 0xb8b   :  { %2979 = vmatpush3.bf16.msra.mxu0 %v3434_v8  ;;  %2769 = vmatprep.mubr.msk.f32.mxu0 %vm3276_vm1, %v3277_v1  ;;  %v817_v4 = vpop.permute.xlu1 %816 }
 0xb8c   :  { %2980 = vmatprep.subr.bf16.mxu0 %v3275_v0 }
 0xb8f   :  { %2982 = vmatpush3.bf16.msra.mxu0 %v3452_v13 }
 0xc5d   :  { %v807_v58 = vpop.f32.mrb[14].mxu0 }
 0xc5e   :  { %v811_v59 = vadd.f32 %v807_v58, %v3499_v31  ;;  %v2749_v60 = vpop.f32.mrb[15].mxu0 }
 0xc60   :  { %3104 = vtanh.f32 %v811_v59 }
 0xc6a   :  { %v3105_v61 = vpop.eup %3104 }
 0xc6b   :  { %821 = vrot.lane.b32.xlu0 %v3105_v61, %s3278_s3  ;;  %v813_v62 = vmul.f32 0.5, %v3105_v61 }
 0xc6d   :  { %v814_v63 = vadd.f32 0.5, %v813_v62 }
 0xc6f   :  { %v819_v5 = vmul.f32 %v817_v4, %v814_v63 }
 0xcdd   :  { %v822_v2 = vpop.permute.xlu0 %821 }
 0xcde   :  { %v824_v3 = vmul.f32 %v822_v2, %v814_v63 }
 0xce0   :  { %826 = vrot.lane.b32.xlu0 %v824_v3, %s3278_s3 }
 0xd52   :  { %v827_v6 = vpop.permute.xlu0 %826 }
 0xd53   :  { %v829_v7 = vadd.f32 %v827_v6, %v819_v5 }
 0xd55   :  { %3106 = vtanh.f32 %v829_v7 }
 0xd5f   :  { %v3107_v9 = vpop.eup %3106 }
 0xd60   :  { %832 = vrot.lane.b32.xlu1 %v3107_v9, %s3278_s3 }
 0xd64   :  { %842 = vrot.lane.b32.xlu1 %v829_v7, %s3279_s10 }
 0xdd2   :  { %v833_v31 = vpop.permute.xlu1 %832 }
 0xdd3   :  { %v835_v10 = vmul.f32 %v833_v31, %v814_v63 }
 0xdd5   :  { %837 = vrot.lane.b32.xlu0 %v835_v10, %s3280_s22 }
 0xdd6   :  { %v843_v11 = vpop.permute.xlu1 %842 }
 0xdd7   :  { %845 = vst.msk [vmem:[#allocation5] sm:$0xff] %vm257_vm0, %v843_v11 }
 0xdde   :  { %v849_v12 = vld [vmem:[#allocation5] sm:$0xff] }
 0xddf   :  { %934 = vrot.lane.b32.xlu1 %v849_v12, %s3278_s3 }
 0xe47   :  { %v838_v14 = vpop.permute.xlu0 %837 }
 0xe48   :  { %840 = vst.msk [vmem:[#allocation4] sm:$0xff] %vm257_vm0, %v838_v14  ;;  %847 = vst.msk [vmem:[#allocation2 + $0x20] sm:$0xff] %vm257_vm0, %v838_v14 }
 0xe4f   :  { %v848_v15 = vld [vmem:[#allocation4] sm:$0xff] }
 0xe50   :  { %2759 = vmatmul.mubr.msk.f32.vlgmr.msra.gmra.mrb[2].mxu1 %vm257_vm0, %v848_v15  ;;  %v1206_v47 = vld [vmem:[#allocation2 + $0x20] sm:$0xff] }
 0xe51   :  { %2985 = vmatpush3.bf16.msra.mxu1 %v3434_v8  ;;  %2780 = vmatprep.mubr.msk.f32.mxu1 %vm3276_vm1, %v3277_v1  ;;  %v935_v23 = vpop.permute.xlu1 %934 }
 0xe52   :  { %2986 = vmatprep.subr.bf16.mxu1 %v3275_v0 }
 0xe55   :  { %2988 = vmatpush3.bf16.msra.mxu1 %v3452_v13 }
 0xe56   :  { %2997 = vmatprep.subr.bf16.mxu1 %v3275_v0 }
 0xf23   :  { %v925_v16 = vpop.f32.mrb[2].mxu1 }
 0xf24   :  { %v929_v17 = vadd.f32 %v925_v16, %v3497_v29  ;;  %v2760_v18 = vpop.f32.mrb[3].mxu1  ;;  %v1210_v29 = vld [vmem:[%s3845_s4] sm:$0xff] }
 0xf25   :  { %v2989_v32 = vpack.c.bf16 %v1211_v30, %v1210_v29 }
 0xf26   :  { %3108 = vtanh.f32 %v929_v17 }
 0xf27   :  { %2990 = vmatprep.subr.bf16.mxu0 %v2989_v32 }
 0xf30   :  { %v3109_v19 = vpop.eup %3108 }
 0xf31   :  { %939 = vrot.lane.b32.xlu0 %v3109_v19, %s3278_s3  ;;  %v931_v20 = vmul.f32 0.5, %v3109_v19 }
 0xf33   :  { %v932_v21 = vadd.f32 0.5, %v931_v20 }
 0xf35   :  { %v937_v24 = vmul.f32 %v935_v23, %v932_v21 }
 0xfa3   :  { %v940_v8 = vpop.permute.xlu0 %939 }
 0xfa4   :  { %v942_v22 = vmul.f32 %v940_v8, %v932_v21 }
 0xfa6   :  { %944 = vrot.lane.b32.xlu0 %v942_v22, %s3278_s3 }
0x1018   :  { %v945_v26 = vpop.permute.xlu0 %944 }
0x1019   :  { %v947_v13 = vadd.f32 %v945_v26, %v937_v24  ;;  %v1364_v24 = vld [vmem:[%s3846_s5 + $0x8] sm:$0xff] }
0x101b   :  { %3110 = vtanh.f32 %v947_v13 }
0x1025   :  { %v3111_v28 = vpop.eup %3110 }
0x1026   :  { %950 = vrot.lane.b32.xlu1 %v3111_v28, %s3278_s3  ;;  %v1366_v28 = vld [vmem:[%s3846_s5 + $0x18] sm:$0xff] }
0x102a   :  { %960 = vrot.lane.b32.xlu1 %v947_v13, %s3279_s10  ;;  %v1365_v13 = vld [vmem:[%s3846_s5 + $0x10] sm:$0xff] }
0x102b   :  { %v3664_v29 = vpack.c.bf16 %v1366_v28, %v1365_v13 }
0x1098   :  { %v951_v27 = vpop.permute.xlu1 %950 }
0x1099   :  { %v953_v34 = vmul.f32 %v951_v27, %v932_v21 }
0x109b   :  { %955 = vrot.lane.b32.xlu0 %v953_v34, %s3280_s22 }
0x109c   :  { %v961_v36 = vpop.permute.xlu1 %960 }
0x109d   :  { %963 = vst.msk [vmem:[#allocation5] sm:$0xff] %vm257_vm0, %v961_v36 }
0x10a4   :  { %v967_v37 = vld [vmem:[#allocation5] sm:$0xff] }
0x10a5   :  { %1052 = vrot.lane.b32.xlu1 %v967_v37, %s3278_s3 }
0x110d   :  { %v956_v38 = vpop.permute.xlu0 %955 }
0x110e   :  { %958 = vst.msk [vmem:[#allocation4] sm:$0xff] %vm257_vm0, %v956_v38  ;;  %965 = vst.msk [vmem:[#allocation2 + $0x28] sm:$0xff] %vm257_vm0, %v956_v38 }
0x1115   :  { %v966_v42 = vld [vmem:[#allocation4] sm:$0xff]  ;;  %v1207_v48 = vld [vmem:[#allocation2 + $0x28] sm:$0xff] }
0x1116   :  { %2770 = vmatmul.mubr.msk.f32.vlgmr.msra.gmra.mrb[16].mxu0 %vm257_vm0, %v966_v42 }
0x1117   :  { %2992 = vmatpush3.bf16.msra.mxu0 %v2989_v32  ;;  %2791 = vmatprep.mubr.msk.f32.mxu0 %vm257_vm0, %v1202_v43  ;;  %v1053_v61 = vpop.permute.xlu1 %1052 }
0x1118   :  { %2994 = vmatprep.subr.bf16.mxu0 %v2993_v41 }
0x111b   :  { %2996 = vmatpush3.bf16.msra.mxu0 %v2993_v41 }
0x111c   :  { %3009 = vmatprep.subr.bf16.mxu0 %v3275_v0 }
0x111e   :  { %2792 = vmatmul.mubr.msk.f32.vlgmr.msra.gmra.mrb[18].mxu0 %vm257_vm0, %v1203_v44 }
0x111f   :  { %2794 = vmatprep.mubr.msk.f32.mxu0 %vm257_vm0, %v1204_v45 }
0x1122   :  { %2795 = vmatmul.mubr.msk.f32.gmra.mrb[20].mxu0 %vm257_vm0, %v1205_v46 }
0x1123   :  { %2797 = vmatprep.mubr.msk.f32.mxu0 %vm257_vm0, %v1206_v47 }
0x1126   :  { %2798 = vmatmul.mubr.msk.f32.gmra.mrb[22].mxu0 %vm257_vm0, %v1207_v48 }
0x11e9   :  { %v1043_v49 = vpop.f32.mrb[16].mxu0 }
0x11ea   :  { %v1047_v50 = vadd.f32 %v1043_v49, %v3503_v35  ;;  %v2771_v51 = vpop.f32.mrb[17].mxu0 }
0x11ec   :  { %3112 = vtanh.f32 %v1047_v50 }
0x11f1   :  { %v3619_v52 = vpop.f32.mrb[18].mxu0 }
0x11f2   :  { %v3621_v25 = vpop.f32.mrb[19].mxu0 }
0x11f3   :  { %v1312_v40 = vadd.f32 %v3695_v39, %v3621_v25 }
0x11f5   :  { %v3623_v53 = vpop.f32.mrb[20].mxu0 }
0x11f6   :  { %v3113_v54 = vpop.eup %3112  ;;  %v3625_v55 = vpop.f32.mrb[21].mxu0 }
0x11f7   :  { %1057 = vrot.lane.b32.xlu0 %v3113_v54, %s3278_s3  ;;  %v1049_v58 = vmul.f32 0.5, %v3113_v54 }
0x11f9   :  { %v3628_v56 = vpop.f32.mrb[22].mxu0  ;;  %v1050_v59 = vadd.f32 0.5, %v1049_v58 }
0x11fa   :  { %v3630_v57 = vpop.f32.mrb[23].mxu0 }
0x11fb   :  { %v1055_v62 = vmul.f32 %v1053_v61, %v1050_v59 }
0x1269   :  { %v1058_v35 = vpop.permute.xlu0 %1057 }
0x126a   :  { %v1060_v60 = vmul.f32 %v1058_v35, %v1050_v59 }
0x126c   :  { %1062 = vrot.lane.b32.xlu0 %v1060_v60, %s3278_s3 }
0x12de   :  { %v1063_v63 = vpop.permute.xlu0 %1062 }
0x12df   :  { %v1065_v2 = vadd.f32 %v1063_v63, %v1055_v62 }
0x12e1   :  { %3114 = vtanh.f32 %v1065_v2 }
0x12eb   :  { %v3115_v3 = vpop.eup %3114 }
0x12ec   :  { %1068 = vrot.lane.b32.xlu1 %v3115_v3, %s3278_s3  ;;  %v1317_v3 = vadd.f32 %v3619_v52, %v3695_v39 }
0x12f0   :  { %1078 = vrot.lane.b32.xlu1 %v1065_v2, %s3279_s10 }
0x135e   :  { %v1069_v4 = vpop.permute.xlu1 %1068 }
0x135f   :  { %v1071_v5 = vmul.f32 %v1069_v4, %v1050_v59 }
0x1361   :  { %1073 = vrot.lane.b32.xlu0 %v1071_v5, %s3280_s22 }
0x1362   :  { %v1079_v6 = vpop.permute.xlu1 %1078 }
0x1363   :  { %1081 = vst.msk [vmem:[#allocation5] sm:$0xff] %vm257_vm0, %v1079_v6 }
0x136a   :  { %v1085_v7 = vld [vmem:[#allocation5] sm:$0xff] }
0x136b   :  { %1170 = vrot.lane.b32.xlu1 %v1085_v7, %s3278_s3 }
0x13d3   :  { %v1074_v9 = vpop.permute.xlu0 %1073 }
0x13d4   :  { %1076 = vst.msk [vmem:[#allocation4] sm:$0xff] %vm257_vm0, %v1074_v9  ;;  %1083 = vst.msk [vmem:[#allocation2 + $0x30] sm:$0xff] %vm257_vm0, %v1074_v9 }
0x13db   :  { %v1084_v31 = vld [vmem:[#allocation4] sm:$0xff]  ;;  %v1208_v10 = vld [vmem:[#allocation2 + $0x30] sm:$0xff] }
0x13dc   :  { %2781 = vmatmul.mubr.msk.f32.vlgmr.msra.gmra.mrb[4].mxu1 %vm257_vm0, %v1084_v31  ;;  %2800 = vmatprep.mubr.msk.f32.mxu0 %vm257_vm0, %v1208_v10 }
0x13dd   :  { %2811 = vmatprep.mubr.msk.f32.mxu1 %vm3276_vm1, %v3277_v1  ;;  %v1171_v20 = vpop.permute.xlu1 %1170 }
0x14af   :  { %v1161_v11 = vpop.f32.mrb[4].mxu1 }
0x14b0   :  { %v1165_v12 = vadd.f32 %v1161_v11, %v3501_v33  ;;  %v2782_v14 = vpop.f32.mrb[5].mxu1  ;;  %v1363_v33 = vld [vmem:[%s3846_s5] sm:$0xff] }
0x14b1   :  { %v3655_v26 = vpack.c.bf16 %v1364_v24, %v1363_v33 }
0x14b2   :  { %3116 = vtanh.f32 %v1165_v12 }
0x14b3   :  { %2999 = vmatpush3.bf16.msra.mxu1 %v3655_v26  ;;  %3011 = vmatpush3.bf16.msra.mxu0 %v3655_v26 }
0x14b4   :  { %3000 = vmatprep.subr.bf16.mxu1 %v3275_v0  ;;  %3012 = vmatprep.subr.bf16.mxu0 %v3275_v0 }
0x14b7   :  { %3002 = vmatpush3.bf16.msra.mxu1 %v3664_v29  ;;  %3014 = vmatpush3.bf16.msra.mxu0 %v3664_v29 }
0x14b8   :  { %3003 = vmatprep.subr.bf16.mxu1 %v3275_v0  ;;  %3021 = vmatprep.subr.bf16.mxu0 %v3275_v0 }
0x14bc   :  { %v3117_v15 = vpop.eup %3116 }
0x14bd   :  { %1175 = vrot.lane.b32.xlu0 %v3117_v15, %s3278_s3  ;;  %v1167_v16 = vmul.f32 0.5, %v3117_v15 }
0x14bf   :  { %v1168_v17 = vadd.f32 0.5, %v1167_v16 }
0x14c1   :  { %v1173_v21 = vmul.f32 %v1171_v20, %v1168_v17 }
0x152f   :  { %v1176_v18 = vpop.permute.xlu0 %1175 }
0x1530   :  { %v1178_v19 = vmul.f32 %v1176_v18, %v1168_v17 }
0x1532   :  { %1180 = vrot.lane.b32.xlu0 %v1178_v19, %s3278_s3 }
0x15a4   :  { %v1181_v8 = vpop.permute.xlu0 %1180 }
0x15a5   :  { %v1183_v22 = vadd.f32 %v1181_v8, %v1173_v21 }
0x15a7   :  { %3118 = vtanh.f32 %v1183_v22 }
0x15b1   :  { %v3119_v23 = vpop.eup %3118 }
0x15b2   :  { %1186 = vrot.lane.b32.xlu1 %v3119_v23, %s3278_s3 }
0x15b6   :  { %1196 = vrot.lane.b32.xlu1 %v1183_v22, %s3279_s10  ;;  %v1322_v22 = vadd.f32 %v3695_v39, %v3625_v55 }
0x1624   :  { %v1187_v30 = vpop.permute.xlu1 %1186 }
0x1625   :  { %v1189_v32 = vmul.f32 %v1187_v30, %v1168_v17 }
0x1627   :  { %1191 = vrot.lane.b32.xlu0 %v1189_v32, %s3280_s22 }
0x1628   :  { %v1197_v27 = vpop.permute.xlu1 %1196 }
0x1629   :  { %1199 = vst.msk [vmem:[#allocation5] sm:$0xff] %vm257_vm0, %v1197_v27 }
0x162a   :  { %1359 = vst.msk [vmem:[#allocation5] sm:$0xff] %vm257_vm0, %v3277_v1 }
0x1631   :  { %v1361_v34 = vld [vmem:[#allocation5] sm:$0xff] }
0x1632   :  { %1445 = vrot.lane.b32.xlu1 %v1361_v34, %s3278_s3 }
0x1699   :  { %v1192_v36 = vpop.permute.xlu0 %1191 }
0x169a   :  { %1194 = vst.msk [vmem:[#allocation4] sm:$0xff] %vm257_vm0, %v1192_v36  ;;  %1201 = vst.msk [vmem:[#allocation2 + $0x38] sm:$0xff] %vm257_vm0, %v1192_v36 }
0x169b   :  { %1358 = vst.msk [vmem:[#allocation4] sm:$0xff] %vm257_vm0, %v3277_v1 }
0x16a1   :  { %v1209_v37 = vld [vmem:[#allocation2 + $0x38] sm:$0xff] }
0x16a2   :  { %2801 = vmatmul.mubr.msk.f32.gmra.mrb[24].mxu0 %vm257_vm0, %v1209_v37  ;;  %v1360_v38 = vld [vmem:[#allocation4] sm:$0xff] }
0x16a3   :  { %2812 = vmatmul.mubr.msk.f32.vlgmr.msra.gmra.mrb[6].mxu1 %vm257_vm0, %v1360_v38  ;;  %2833 = vmatprep.mubr.msk.f32.mxu0 %vm3276_vm1, %v3277_v1 }
0x16a4   :  { %3005 = vmatpush3.bf16.msra.mxu1 %v3655_v26  ;;  %2822 = vmatprep.mubr.msk.f32.mxu1 %vm3276_vm1, %v3277_v1  ;;  %v1446_v51 = vpop.permute.xlu1 %1445 }
0x16a5   :  { %3006 = vmatprep.subr.bf16.mxu1 %v3275_v0 }
0x16a8   :  { %3008 = vmatpush3.bf16.msra.mxu1 %v3664_v29 }
0x16a9   :  { %3015 = vmatprep.subr.bf16.mxu1 %v3275_v0 }
0x1775   :  { %v3699_v41 = vpop.f32.mrb[24].mxu0 }
0x1776   :  { %v3701_v42 = vpop.f32.mrb[25].mxu0  ;;  %v1436_v43 = vpop.f32.mrb[6].mxu1 }
0x1777   :  { %v1440_v44 = vadd.f32 %v1436_v43, %v1312_v40  ;;  %v2813_v45 = vpop.f32.mrb[7].mxu1 }
0x1779   :  { %3120 = vtanh.f32 %v1440_v44 }
0x1783   :  { %v3121_v46 = vpop.eup %3120 }
0x1784   :  { %1450 = vrot.lane.b32.xlu0 %v3121_v46, %s3278_s3  ;;  %v1442_v47 = vmul.f32 0.5, %v3121_v46 }
0x1786   :  { %v1443_v48 = vadd.f32 0.5, %v1442_v47 }
0x1788   :  { %v1448_v54 = vmul.f32 %v1446_v51, %v1443_v48 }
0x17f6   :  { %v1451_v49 = vpop.permute.xlu0 %1450 }
0x17f7   :  { %v1453_v50 = vmul.f32 %v1451_v49, %v1443_v48 }
0x17f9   :  { %1455 = vrot.lane.b32.xlu0 %v1453_v50, %s3278_s3 }
0x186b   :  { %v1456_v25 = vpop.permute.xlu0 %1455 }
0x186c   :  { %v1458_v58 = vadd.f32 %v1456_v25, %v1448_v54 }
0x186e   :  { %3122 = vtanh.f32 %v1458_v58 }
0x1878   :  { %v3123_v59 = vpop.eup %3122 }
0x1879   :  { %1461 = vrot.lane.b32.xlu1 %v3123_v59, %s3278_s3 }
0x187d   :  { %1471 = vrot.lane.b32.xlu1 %v1458_v58, %s3279_s10 }
0x18eb   :  { %v1462_v35 = vpop.permute.xlu1 %1461 }
0x18ec   :  { %v1464_v60 = vmul.f32 %v1462_v35, %v1443_v48  ;;  %v1327_v48 = vadd.f32 %v3623_v53, %v3695_v39 }
0x18ee   :  { %1466 = vrot.lane.b32.xlu0 %v1464_v60, %s3280_s22 }
0x18ef   :  { %v1472_v61 = vpop.permute.xlu1 %1471 }
0x18f0   :  { %1474 = vst.msk [vmem:[#allocation5] sm:$0xff] %vm257_vm0, %v1472_v61 }
0x18f7   :  { %v1477_v62 = vld [vmem:[#allocation5] sm:$0xff] }
0x18f8   :  { %1561 = vrot.lane.b32.xlu1 %v1477_v62, %s3278_s3 }
0x1960   :  { %v1467_v63 = vpop.permute.xlu0 %1466 }
0x1961   :  { %1469 = vst.msk [vmem:[#allocation4] sm:$0xff] %vm257_vm0, %v1467_v63  ;;  %1475 = vst.msk [vmem:[#allocation2] sm:$0xff] %vm257_vm0, %v1467_v63 }
0x1968   :  { %v1476_v2 = vld [vmem:[#allocation4] sm:$0xff] }
0x1969   :  { %2823 = vmatmul.mubr.msk.f32.vlgmr.msra.gmra.mrb[8].mxu1 %vm257_vm0, %v1476_v2 }
0x196a   :  { %3017 = vmatpush3.bf16.msra.mxu1 %v3655_v26  ;;  %2844 = vmatprep.mubr.msk.f32.mxu1 %vm3276_vm1, %v3277_v1  ;;  %v1562_v12 = vpop.permute.xlu1 %1561 }
0x196b   :  { %3018 = vmatprep.subr.bf16.mxu1 %v3275_v0 }
0x196e   :  { %3020 = vmatpush3.bf16.msra.mxu1 %v3664_v29 }
0x196f   :  { %3027 = vmatprep.subr.bf16.mxu1 %v3275_v0 }
0x1a3c   :  { %v1552_v4 = vpop.f32.mrb[8].mxu1 }
0x1a3d   :  { %v1556_v5 = vadd.f32 %v1552_v4, %v1317_v3  ;;  %v2824_v6 = vpop.f32.mrb[9].mxu1 }
0x1a3f   :  { %3124 = vtanh.f32 %v1556_v5 }
0x1a49   :  { %v3125_v7 = vpop.eup %3124 }
0x1a4a   :  { %1566 = vrot.lane.b32.xlu0 %v3125_v7, %s3278_s3  ;;  %v1558_v9 = vmul.f32 0.5, %v3125_v7 }
0x1a4c   :  { %v1559_v31 = vadd.f32 0.5, %v1558_v9  ;;  %v1332_v9 = vadd.f32 %v3695_v39, %v3630_v57 }
0x1a4e   :  { %v1564_v14 = vmul.f32 %v1562_v12, %v1559_v31 }
0x1abc   :  { %v1567_v10 = vpop.permute.xlu0 %1566 }
0x1abd   :  { %v1569_v11 = vmul.f32 %v1567_v10, %v1559_v31 }
0x1abf   :  { %1571 = vrot.lane.b32.xlu0 %v1569_v11, %s3278_s3 }
0x1b31   :  { %v1572_v15 = vpop.permute.xlu0 %1571 }
0x1b32   :  { %v1574_v16 = vadd.f32 %v1572_v15, %v1564_v14 }
0x1b34   :  { %3126 = vtanh.f32 %v1574_v16 }
0x1b3e   :  { %v3127_v17 = vpop.eup %3126 }
0x1b3f   :  { %1577 = vrot.lane.b32.xlu1 %v3127_v17, %s3278_s3 }
0x1b43   :  { %1587 = vrot.lane.b32.xlu1 %v1574_v16, %s3279_s10 }
0x1bb1   :  { %v1578_v52 = vpop.permute.xlu1 %1577 }
0x1bb2   :  { %v1580_v18 = vmul.f32 %v1578_v52, %v1559_v31 }
0x1bb4   :  { %1582 = vrot.lane.b32.xlu0 %v1580_v18, %s3280_s22 }
0x1bb5   :  { %v1588_v19 = vpop.permute.xlu1 %1587 }
0x1bb6   :  { %1590 = vst.msk [vmem:[#allocation5] sm:$0xff] %vm257_vm0, %v1588_v19 }
0x1bbd   :  { %v1593_v20 = vld [vmem:[#allocation5] sm:$0xff] }
0x1bbe   :  { %1677 = vrot.lane.b32.xlu1 %v1593_v20, %s3278_s3 }
0x1c26   :  { %v1583_v21 = vpop.permute.xlu0 %1582 }
0x1c27   :  { %1585 = vst.msk [vmem:[#allocation4] sm:$0xff] %vm257_vm0, %v1583_v21  ;;  %1591 = vst.msk [vmem:[#allocation2 + $0x8] sm:$0xff] %vm257_vm0, %v1583_v21 }
0x1c2e   :  { %v1592_v8 = vld [vmem:[#allocation4] sm:$0xff] }
0x1c2f   :  { %2834 = vmatmul.mubr.msk.f32.vlgmr.msra.gmra.mrb[26].mxu0 %vm257_vm0, %v1592_v8 }
0x1c30   :  { %3023 = vmatpush3.bf16.msra.mxu0 %v3655_v26  ;;  %2855 = vmatprep.mubr.msk.f32.mxu0 %vm3276_vm1, %v3277_v1  ;;  %v1678_v34 = vpop.permute.xlu1 %1677 }
0x1c31   :  { %3024 = vmatprep.subr.bf16.mxu0 %v3275_v0 }
0x1c34   :  { %3026 = vmatpush3.bf16.msra.mxu0 %v3664_v29 }
0x1c35   :  { %3033 = vmatprep.subr.bf16.mxu0 %v3275_v0 }
0x1d02   :  { %v1668_v23 = vpop.f32.mrb[26].mxu0 }
0x1d03   :  { %v1672_v33 = vadd.f32 %v1668_v23, %v1322_v22  ;;  %v2835_v24 = vpop.f32.mrb[27].mxu0 }
0x1d05   :  { %3128 = vtanh.f32 %v1672_v33 }
0x1d0f   :  { %v3129_v13 = vpop.eup %3128 }
0x1d10   :  { %1682 = vrot.lane.b32.xlu0 %v3129_v13, %s3278_s3  ;;  %v1674_v28 = vmul.f32 0.5, %v3129_v13  ;;  %v1337_v13 = vadd.f32 %v3628_v56, %v3695_v39 }
0x1d12   :  { %v1675_v30 = vadd.f32 0.5, %v1674_v28 }
0x1d14   :  { %v1680_v36 = vmul.f32 %v1678_v34, %v1675_v30 }
0x1d82   :  { %v1683_v32 = vpop.permute.xlu0 %1682 }
0x1d83   :  { %v1685_v27 = vmul.f32 %v1683_v32, %v1675_v30 }
0x1d85   :  { %1687 = vrot.lane.b32.xlu0 %v1685_v27, %s3278_s3 }
0x1df7   :  { %v1688_v37 = vpop.permute.xlu0 %1687 }
0x1df8   :  { %v1690_v38 = vadd.f32 %v1688_v37, %v1680_v36 }
0x1dfa   :  { %3130 = vtanh.f32 %v1690_v38 }
0x1e04   :  { %v3131_v40 = vpop.eup %3130 }
0x1e05   :  { %1693 = vrot.lane.b32.xlu1 %v3131_v40, %s3278_s3 }
0x1e09   :  { %1703 = vrot.lane.b32.xlu1 %v1690_v38, %s3279_s10 }
0x1e77   :  { %v1694_v55 = vpop.permute.xlu1 %1693 }
0x1e78   :  { %v1696_v43 = vmul.f32 %v1694_v55, %v1675_v30 }
0x1e7a   :  { %1698 = vrot.lane.b32.xlu0 %v1696_v43, %s3280_s22 }
0x1e7b   :  { %v1704_v44 = vpop.permute.xlu1 %1703 }
0x1e7c   :  { %1706 = vst.msk [vmem:[#allocation5] sm:$0xff] %vm257_vm0, %v1704_v44 }
0x1e83   :  { %v1709_v45 = vld [vmem:[#allocation5] sm:$0xff] }
0x1e84   :  { %1793 = vrot.lane.b32.xlu1 %v1709_v45, %s3278_s3 }
0x1eec   :  { %v1699_v46 = vpop.permute.xlu0 %1698 }
0x1eed   :  { %1701 = vst.msk [vmem:[#allocation4] sm:$0xff] %vm257_vm0, %v1699_v46  ;;  %1707 = vst.msk [vmem:[#allocation2 + $0x10] sm:$0xff] %vm257_vm0, %v1699_v46 }
0x1ef4   :  { %v1708_v47 = vld [vmem:[#allocation4] sm:$0xff] }
0x1ef5   :  { %2845 = vmatmul.mubr.msk.f32.vlgmr.msra.gmra.mrb[10].mxu1 %vm257_vm0, %v1708_v47 }
0x1ef6   :  { %3029 = vmatpush3.bf16.msra.mxu1 %v3655_v26  ;;  %2866 = vmatprep.mubr.msk.f32.mxu1 %vm3276_vm1, %v3277_v1  ;;  %v1794_v60 = vpop.permute.xlu1 %1793 }
0x1ef7   :  { %3030 = vmatprep.subr.bf16.mxu1 %v3275_v0 }
0x1efa   :  { %3032 = vmatpush3.bf16.msra.mxu1 %v3664_v29 }
0x1efb   :  { %3039 = vmatprep.subr.bf16.mxu1 %v3275_v0 }
0x1fc8   :  { %v1784_v49 = vpop.f32.mrb[10].mxu1 }
0x1fc9   :  { %v1788_v50 = vadd.f32 %v1784_v49, %v1327_v48  ;;  %v2846_v51 = vpop.f32.mrb[11].mxu1  ;;  %v1342_v49 = vadd.f32 %v3695_v39, %v3701_v42 }
0x1fcb   :  { %3132 = vtanh.f32 %v1788_v50 }
0x1fd5   :  { %v3133_v54 = vpop.eup %3132 }
0x1fd6   :  { %1798 = vrot.lane.b32.xlu0 %v3133_v54, %s3278_s3  ;;  %v1790_v25 = vmul.f32 0.5, %v3133_v54 }
0x1fd8   :  { %v1791_v58 = vadd.f32 0.5, %v1790_v25 }
0x1fda   :  { %v1796_v61 = vmul.f32 %v1794_v60, %v1791_v58 }
0x2048   :  { %v1799_v59 = vpop.permute.xlu0 %1798 }
0x2049   :  { %v1801_v35 = vmul.f32 %v1799_v59, %v1791_v58 }
0x204b   :  { %1803 = vrot.lane.b32.xlu0 %v1801_v35, %s3278_s3 }
0x20bd   :  { %v1804_v62 = vpop.permute.xlu0 %1803 }
0x20be   :  { %v1806_v63 = vadd.f32 %v1804_v62, %v1796_v61 }
0x20c0   :  { %3134 = vtanh.f32 %v1806_v63 }
0x20ca   :  { %v3135_v2 = vpop.eup %3134 }
0x20cb   :  { %1809 = vrot.lane.b32.xlu1 %v3135_v2, %s3278_s3 }
0x20cf   :  { %1819 = vrot.lane.b32.xlu1 %v1806_v63, %s3279_s10 }
0x213d   :  { %v1810_v53 = vpop.permute.xlu1 %1809 }
0x213e   :  { %v1812_v3 = vmul.f32 %v1810_v53, %v1791_v58 }
0x2140   :  { %1814 = vrot.lane.b32.xlu0 %v1812_v3, %s3280_s22 }
0x2141   :  { %v1820_v4 = vpop.permute.xlu1 %1819 }
0x2142   :  { %1822 = vst.msk [vmem:[#allocation5] sm:$0xff] %vm257_vm0, %v1820_v4 }
0x2149   :  { %v1825_v5 = vld [vmem:[#allocation5] sm:$0xff] }
0x214a   :  { %1909 = vrot.lane.b32.xlu1 %v1825_v5, %s3278_s3 }
0x21b2   :  { %v1815_v6 = vpop.permute.xlu0 %1814 }
0x21b3   :  { %1817 = vst.msk [vmem:[#allocation4] sm:$0xff] %vm257_vm0, %v1815_v6  ;;  %1823 = vst.msk [vmem:[#allocation2 + $0x18] sm:$0xff] %vm257_vm0, %v1815_v6 }
0x21ba   :  { %v1824_v7 = vld [vmem:[#allocation4] sm:$0xff] }
0x21bb   :  { %2856 = vmatmul.mubr.msk.f32.vlgmr.msra.gmra.mrb[28].mxu0 %vm257_vm0, %v1824_v7 }
0x21bc   :  { %3035 = vmatpush3.bf16.msra.mxu0 %v3655_v26  ;;  %2877 = vmatprep.mubr.msk.f32.mxu0 %vm3276_vm1, %v3277_v1  ;;  %v1910_v52 = vpop.permute.xlu1 %1909 }
0x21bd   :  { %3036 = vmatprep.subr.bf16.mxu0 %v3275_v0 }
0x21c0   :  { %3038 = vmatpush3.bf16.msra.mxu0 %v3664_v29 }
0x21c1   :  { %3045 = vmatprep.subr.bf16.mxu0 %v3275_v0 }
0x228e   :  { %v1900_v31 = vpop.f32.mrb[28].mxu0 }
0x228f   :  { %v1904_v10 = vadd.f32 %v1900_v31, %v1332_v9  ;;  %v2857_v11 = vpop.f32.mrb[29].mxu0  ;;  %v1347_v9 = vadd.f32 %v3699_v41, %v3695_v39  ;;  %v2304_v39 = vld [vmem:[#allocation8] sm:$0xff]  ;;  %v2305_v41 = vld [vmem:[#allocation8 + $0x8] sm:$0xff] }
0x2291   :  { %3136 = vtanh.f32 %v1904_v10 }
0x229b   :  { %v3137_v12 = vpop.eup %3136 }
0x229c   :  { %1914 = vrot.lane.b32.xlu0 %v3137_v12, %s3278_s3  ;;  %v1906_v14 = vmul.f32 0.5, %v3137_v12 }
0x229e   :  { %v1907_v15 = vadd.f32 0.5, %v1906_v14 }
0x22a0   :  { %v1912_v18 = vmul.f32 %v1910_v52, %v1907_v15 }
0x230e   :  { %v1915_v16 = vpop.permute.xlu0 %1914 }
0x230f   :  { %v1917_v17 = vmul.f32 %v1915_v16, %v1907_v15 }
0x2311   :  { %1919 = vrot.lane.b32.xlu0 %v1917_v17, %s3278_s3 }
0x2383   :  { %v1920_v19 = vpop.permute.xlu0 %1919 }
0x2384   :  { %v1922_v20 = vadd.f32 %v1920_v19, %v1912_v18 }
0x2386   :  { %3138 = vtanh.f32 %v1922_v20 }
0x2390   :  { %v3139_v21 = vpop.eup %3138 }
0x2391   :  { %1925 = vrot.lane.b32.xlu1 %v3139_v21, %s3278_s3  ;;  %v2306_v21 = vld [vmem:[#allocation8 + $0x10] sm:$0xff] }
0x2395   :  { %1935 = vrot.lane.b32.xlu1 %v1922_v20, %s3279_s10 }
0x2403   :  { %v1926_v57 = vpop.permute.xlu1 %1925 }
0x2404   :  { %v1928_v8 = vmul.f32 %v1926_v57, %v1907_v15  ;;  %v3046_v57 = vpack.c.bf16 %v2305_v41, %v2304_v39  ;;  %v2552_v39 = vld [vmem:[#allocation10] ss:$0 sm:$0xff] }
0x2406   :  { %1930 = vrot.lane.b32.xlu0 %v1928_v8, %s3280_s22  ;;  %v2307_v8 = vld [vmem:[#allocation8 + $0x18] sm:$0xff] }
0x2407   :  { %v1936_v22 = vpop.permute.xlu1 %1935 }
0x2408   :  { %1938 = vst.msk [vmem:[#allocation5] sm:$0xff] %vm257_vm0, %v1936_v22  ;;  %v3049_v22 = vpack.c.bf16 %v2307_v8, %v2306_v21 }
0x240f   :  { %v1941_v23 = vld [vmem:[#allocation5] sm:$0xff] }
0x2410   :  { %2025 = vrot.lane.b32.xlu1 %v1941_v23, %s3278_s3 }
0x2478   :  { %v1931_v33 = vpop.permute.xlu0 %1930 }
0x2479   :  { %1933 = vst.msk [vmem:[#allocation4] sm:$0xff] %vm257_vm0, %v1931_v33  ;;  %1939 = vst.msk [vmem:[#allocation2 + $0x20] sm:$0xff] %vm257_vm0, %v1931_v33 }
0x2480   :  { %v1940_v24 = vld [vmem:[#allocation4] sm:$0xff] }
0x2481   :  { %2867 = vmatmul.mubr.msk.f32.vlgmr.msra.gmra.mrb[12].mxu1 %vm257_vm0, %v1940_v24  ;;  %v2417_v24 = vld [vmem:[#allocation11] sm:$0xff] }
0x2482   :  { %3041 = vmatpush3.bf16.msra.mxu1 %v3655_v26  ;;  %2888 = vmatprep.mubr.msk.f32.mxu1 %vm3276_vm1, %v3277_v1  ;;  %v2026_v38 = vpop.permute.xlu1 %2025 }
0x2483   :  { %3042 = vmatprep.subr.bf16.mxu1 %v3275_v0 }
0x2486   :  { %3044 = vmatpush3.bf16.msra.mxu1 %v3664_v29 }
0x2487   :  { %3051 = vmatprep.subr.bf16.mxu1 %v3275_v0 }
0x2554   :  { %v2016_v28 = vpop.f32.mrb[12].mxu1 }
0x2555   :  { %v2020_v30 = vadd.f32 %v2016_v28, %v1337_v13  ;;  %v2868_v32 = vpop.f32.mrb[13].mxu1  ;;  %v2418_v13 = vld [vmem:[#allocation11 + $0x8] sm:$0xff]  ;;  %v2419_v28 = vld [vmem:[#allocation11 + $0x10] sm:$0xff] }
0x2556   :  { %v3052_v32 = vpack.c.bf16 %v2418_v13, %v2417_v24 }
0x2557   :  { %3140 = vtanh.f32 %v2020_v30 }
0x2561   :  { %v3141_v27 = vpop.eup %3140 }
0x2562   :  { %2030 = vrot.lane.b32.xlu0 %v3141_v27, %s3278_s3  ;;  %v2022_v26 = vmul.f32 0.5, %v3141_v27  ;;  %v2420_v27 = vld [vmem:[#allocation11 + $0x18] sm:$0xff] }
0x2564   :  { %v2023_v34 = vadd.f32 0.5, %v2022_v26  ;;  %v3055_v26 = vpack.c.bf16 %v2420_v27, %v2419_v28 }
0x2566   :  { %v2028_v29 = vmul.f32 %v2026_v38, %v2023_v34  ;;  %v2423_v38 = vld [vmem:[#allocation11 + $0x30] sm:$0xff] }
0x25d4   :  { %v2031_v36 = vpop.permute.xlu0 %2030 }
0x25d5   :  { %v2033_v37 = vmul.f32 %v2031_v36, %v2023_v34  ;;  %v2422_v36 = vld [vmem:[#allocation11 + $0x28] sm:$0xff] }
0x25d7   :  { %2035 = vrot.lane.b32.xlu0 %v2033_v37, %s3278_s3 }
0x2649   :  { %v2036_v40 = vpop.permute.xlu0 %2035 }
0x264a   :  { %v2038_v55 = vadd.f32 %v2036_v40, %v2028_v29  ;;  %v2424_v29 = vld [vmem:[#allocation11 + $0x38] sm:$0xff] }
0x264b   :  { %v3061_v40 = vpack.c.bf16 %v2424_v29, %v2423_v38 }
0x264c   :  { %3142 = vtanh.f32 %v2038_v55 }
0x2656   :  { %v3143_v43 = vpop.eup %3142 }
0x2657   :  { %2041 = vrot.lane.b32.xlu1 %v3143_v43, %s3278_s3  ;;  %v2426_v43 = vld [vmem:[#allocation11 + $0x48] sm:$0xff] }
0x265b   :  { %2051 = vrot.lane.b32.xlu1 %v2038_v55, %s3279_s10  ;;  %v2425_v55 = vld [vmem:[#allocation11 + $0x40] sm:$0xff] }
0x26c9   :  { %v2042_v56 = vpop.permute.xlu1 %2041 }
0x26ca   :  { %v2044_v44 = vmul.f32 %v2042_v56, %v2023_v34  ;;  %v2421_v34 = vld [vmem:[#allocation11 + $0x20] sm:$0xff]  ;;  %v3064_v56 = vpack.c.bf16 %v2426_v43, %v2425_v55 }
0x26cb   :  { %v3058_v37 = vpack.c.bf16 %v2422_v36, %v2421_v34 }
0x26cc   :  { %2046 = vrot.lane.b32.xlu0 %v2044_v44, %s3280_s22  ;;  %v2427_v44 = vld [vmem:[#allocation11 + $0x50] sm:$0xff] }
0x26cd   :  { %v2052_v45 = vpop.permute.xlu1 %2051 }
0x26ce   :  { %2054 = vst.msk [vmem:[#allocation5] sm:$0xff] %vm257_vm0, %v2052_v45  ;;  %v2428_v45 = vld [vmem:[#allocation11 + $0x58] sm:$0xff] }
0x26d5   :  { %v2057_v46 = vld [vmem:[#allocation5] sm:$0xff] }
0x26d6   :  { %2141 = vrot.lane.b32.xlu1 %v2057_v46, %s3278_s3  ;;  %v3067_v46 = vpack.c.bf16 %v2428_v45, %v2427_v44 }
0x273e   :  { %v2047_v47 = vpop.permute.xlu0 %2046 }
0x273f   :  { %2049 = vst.msk [vmem:[#allocation4] sm:$0xff] %vm257_vm0, %v2047_v47  ;;  %2055 = vst.msk [vmem:[#allocation2 + $0x28] sm:$0xff] %vm257_vm0, %v2047_v47  ;;  %v2429_v47 = vld [vmem:[#allocation11 + $0x60] sm:$0xff] }
0x2746   :  { %v2056_v48 = vld [vmem:[#allocation4] sm:$0xff] }
0x2747   :  { %2878 = vmatmul.mubr.msk.f32.vlgmr.msra.gmra.mrb[30].mxu0 %vm257_vm0, %v2056_v48  ;;  %v2430_v48 = vld [vmem:[#allocation11 + $0x68] sm:$0xff] }
0x2748   :  { %2899 = vmatprep.mubr.msk.f32.mxu0 %vm3276_vm1, %v3277_v1  ;;  %v2142_v61 = vpop.permute.xlu1 %2141  ;;  %3047 = vmatpush3.bf16.msra.mxu0 %v3046_v57 }
0x2749   :  { %3048 = vmatprep.subr.bf16.mxu0 %v3275_v0 }
0x274c   :  { %3050 = vmatpush3.bf16.msra.mxu0 %v3049_v22  ;;  %v2554_v22 = vld [vmem:[#allocation13] ss:$0 sm:$0xff] }
0x281a   :  { %v2132_v50 = vpop.f32.mrb[30].mxu0 }
0x281b   :  { %v2136_v51 = vadd.f32 %v2132_v50, %v1342_v49  ;;  %v2879_v54 = vpop.f32.mrb[31].mxu0  ;;  %v3070_v49 = vpack.c.bf16 %v2430_v48, %v2429_v47  ;;  %v2290_v50 = vld [vmem:[#allocation2 + $0x10] sm:$0xff] }
0x281c   :  { %v2291_v54 = vld [vmem:[#allocation2 + $0x18] sm:$0xff] }
0x281d   :  { %3144 = vtanh.f32 %v2136_v51  ;;  %v2288_v51 = vld [vmem:[#allocation2] sm:$0xff] }
0x2827   :  { %v3145_v25 = vpop.eup %3144 }
0x2828   :  { %2146 = vrot.lane.b32.xlu0 %v3145_v25, %s3278_s3  ;;  %v2138_v58 = vmul.f32 0.5, %v3145_v25  ;;  %v2292_v25 = vld [vmem:[#allocation2 + $0x20] sm:$0xff] }
0x282a   :  { %v2139_v59 = vadd.f32 0.5, %v2138_v58 }
0x282c   :  { %v2144_v62 = vmul.f32 %v2142_v61, %v2139_v59 }
0x289a   :  { %v2147_v35 = vpop.permute.xlu0 %2146 }
0x289b   :  { %v2149_v60 = vmul.f32 %v2147_v35, %v2139_v59  ;;  %v2293_v35 = vld [vmem:[#allocation2 + $0x28] sm:$0xff] }
0x289d   :  { %2151 = vrot.lane.b32.xlu0 %v2149_v60, %s3278_s3  ;;  %v2298_v60 = vmax.f32 %v2290_v50, 0.0 }
0x290f   :  { %v2152_v63 = vpop.permute.xlu0 %2151 }
0x2910   :  { %v2154_v2 = vadd.f32 %v2152_v63, %v2144_v62  ;;  %v2296_v62 = vmax.f32 %v2288_v51, 0.0  ;;  %v2299_v63 = vmax.f32 %v2291_v54, 0.0 }
0x2912   :  { %3146 = vtanh.f32 %v2154_v2 }
0x291c   :  { %v3147_v53 = vpop.eup %3146 }
0x291d   :  { %2157 = vrot.lane.b32.xlu1 %v3147_v53, %s3278_s3 }
0x2921   :  { %2167 = vrot.lane.b32.xlu1 %v2154_v2, %s3279_s10  ;;  %v2300_v2 = vmax.f32 %v2292_v25, 0.0 }
0x298f   :  { %v2158_v42 = vpop.permute.xlu1 %2157 }
0x2990   :  { %v2160_v3 = vmul.f32 %v2158_v42, %v2139_v59  ;;  %v2289_v59 = vld [vmem:[#allocation2 + $0x8] sm:$0xff]  ;;  %v2301_v42 = vmax.f32 %v2293_v35, 0.0 }
0x2991   :  { %v2297_v53 = vmax.f32 %v2289_v59, 0.0 }
0x2992   :  { %2162 = vrot.lane.b32.xlu0 %v2160_v3, %s3280_s22 }
0x2993   :  { %v2168_v4 = vpop.permute.xlu1 %2167 }
0x2994   :  { %2170 = vst.msk [vmem:[#allocation5] sm:$0xff] %vm257_vm0, %v2168_v4  ;;  %v2323_v4 = vrot.slane %v2296_v62, 1 }
0x299b   :  { %v2173_v5 = vld [vmem:[#allocation5] sm:$0xff] }
0x299c   :  { %2257 = vrot.lane.b32.xlu1 %v2173_v5, %s3278_s3  ;;  %v2329_v5 = vrot.slane %v2299_v63, 6 }
0x2a04   :  { %v2163_v6 = vpop.permute.xlu0 %2162 }
0x2a05   :  { %2165 = vst.msk [vmem:[#allocation4] sm:$0xff] %vm257_vm0, %v2163_v6  ;;  %2171 = vst.msk [vmem:[#allocation2 + $0x30] sm:$0xff] %vm257_vm0, %v2163_v6  ;;  %v2332_v6 = vrot.slane %v2300_v2, 5 }
0x2a0c   :  { %v2172_v7 = vld [vmem:[#allocation4] sm:$0xff]  ;;  %v2294_v61 = vld [vmem:[#allocation2 + $0x30] sm:$0xff] }
0x2a0d   :  { %2889 = vmatmul.mubr.msk.f32.vlgmr.msra.gmra.mrb[14].mxu1 %vm257_vm0, %v2172_v7  ;;  %v2302_v3 = vmax.f32 %v2294_v61, 0.0  ;;  %v2325_v7 = vsel %vm2324_vm3, %v2297_v53, %v2323_v4 }
0x2a0e   :  { %2934 = vmatprep.mubr.msk.f32.mxu1 %vm3276_vm1, %v3277_v1  ;;  %v2258_v52 = vpop.permute.xlu1 %2257  ;;  %3053 = vmatpush3.bf16.msra.mxu1 %v3052_v32 }
0x2a0f   :  { %3054 = vmatprep.subr.bf16.mxu1 %v3275_v0 }
0x2a12   :  { %3056 = vmatpush3.bf16.msra.mxu1 %v3055_v26 }
0x2a13   :  { %3057 = vmatprep.subr.bf16.mxu1 %v3275_v0 }
0x2a16   :  { %3059 = vmatpush3.bf16.msra.mxu1 %v3058_v37 }
0x2a17   :  { %3060 = vmatprep.subr.bf16.mxu1 %v3275_v0 }
0x2a1a   :  { %3062 = vmatpush3.bf16.msra.mxu1 %v3061_v40 }
0x2a1b   :  { %3063 = vmatprep.subr.bf16.mxu1 %v3275_v0 }
0x2a1e   :  { %3065 = vmatpush3.bf16.msra.mxu1 %v3064_v56 }
0x2a1f   :  { %3066 = vmatprep.subr.bf16.mxu1 %v3275_v0 }
0x2a22   :  { %3068 = vmatpush3.bf16.msra.mxu1 %v3067_v46 }
0x2a23   :  { %3069 = vmatprep.subr.bf16.mxu1 %v3275_v0 }
0x2a26   :  { %3071 = vmatpush3.bf16.msra.mxu1 %v3070_v49 }
0x2a27   :  { %3072 = vmatprep.subr.bf16.mxu1 %v3275_v0  ;;  %v2326_v0 = vrot.slane %v2298_v60, 7 }
0x2ae0   :  { %v2248_v31 = vpop.f32.mrb[14].mxu1 }
0x2ae1   :  { %v2252_v10 = vadd.f32 %v2248_v31, %v1347_v9  ;;  %v2890_v11 = vpop.f32.mrb[15].mxu1  ;;  %v2335_v9 = vrot.slane %v2301_v42, 4 }
0x2ae2   :  { %v2338_v11 = vrot.slane %v2302_v3, 3 }
0x2ae3   :  { %3148 = vtanh.f32 %v2252_v10  ;;  %v2328_v10 = vsel %vm2327_vm4, %v2326_v0, %v2325_v7 }
0x2aed   :  { %v3149_v12 = vpop.eup %3148 }
0x2aee   :  { %2262 = vrot.lane.b32.xlu0 %v3149_v12, %s3278_s3  ;;  %v2254_v14 = vmul.f32 0.5, %v3149_v12 }
0x2af0   :  { %v2255_v15 = vadd.f32 0.5, %v2254_v14  ;;  %v2331_v14 = vsel %vm2330_vm5, %v2329_v5, %v2328_v10 }
0x2af2   :  { %v2260_v18 = vmul.f32 %v2258_v52, %v2255_v15 }
0x2b60   :  { %v2263_v16 = vpop.permute.xlu0 %2262 }
0x2b61   :  { %v2265_v17 = vmul.f32 %v2263_v16, %v2255_v15 }
0x2b63   :  { %2267 = vrot.lane.b32.xlu0 %v2265_v17, %s3278_s3 }
0x2bd5   :  { %v2268_v19 = vpop.permute.xlu0 %2267 }
0x2bd6   :  { %v2270_v1 = vadd.f32 %v2268_v19, %v2260_v18  ;;  %v2431_v19 = vld [vmem:[#allocation11 + $0x70] sm:$0xff] }
0x2bd8   :  { %3150 = vtanh.f32 %v2270_v1 }
0x2be2   :  { %v3151_v20 = vpop.eup %3150 }
0x2be3   :  { %2273 = vrot.lane.b32.xlu1 %v3151_v20, %s3278_s3 }
0x2be7   :  { %2283 = vrot.lane.b32.xlu1 %v2270_v1, %s3279_s10  ;;  %v2432_v1 = vld [vmem:[#allocation11 + $0x78] sm:$0xff] }
0x2be8   :  { %v3073_v20 = vpack.c.bf16 %v2432_v1, %v2431_v19 }
0x2bea   :  { %3074 = vmatpush3.bf16.msra.mxu1 %v3073_v20 }
0x2c55   :  { %v2274_v23 = vpop.permute.xlu1 %2273 }
0x2c56   :  { %v2276_v33 = vmul.f32 %v2274_v23, %v2255_v15  ;;  %v2334_v15 = vsel %vm2333_vm6, %v2332_v6, %v2331_v14 }
0x2c57   :  { %v2337_v16 = vsel %vm2336_vm7, %v2335_v9, %v2334_v15 }
0x2c58   :  { %2278 = vrot.lane.b32.xlu0 %v2276_v33, %s3280_s22  ;;  %v2340_v52 = vsel %vm2339_vm8, %v2338_v11, %v2337_v16 }
0x2c59   :  { %v2284_v30 = vpop.permute.xlu1 %2283 }
0x2c5a   :  { %2286 = vst.msk [vmem:[#allocation5] sm:$0xff] %vm257_vm0, %v2284_v30 }
0x2cca   :  { %v2279_v58 = vpop.permute.xlu0 %2278 }
0x2ccb   :  { %2281 = vst.msk [vmem:[#allocation4] sm:$0xff] %vm257_vm0, %v2279_v58  ;;  %2287 = vst.msk [vmem:[#allocation2 + $0x38] sm:$0xff] %vm257_vm0, %v2279_v58 }
0x2cd2   :  { %v2295_v31 = vld [vmem:[#allocation2 + $0x38] sm:$0xff] }
0x2cd3   :  { %v2303_v12 = vmax.f32 %v2295_v31, 0.0 }
0x2cd5   :  { %v2341_v17 = vrot.slane %v2303_v12, 2 }
0x2cd7   :  { %v2343_v18 = vsel %vm2342_vm9, %v2341_v17, %v2340_v52 }
0x2cd8   :  { %2900 = vmatmul.mubr.msk.f32.vlgmr.msra.gmra.mrb[32].mxu0 %vm257_vm0, %v2343_v18 }
0x2dab   :  { %v2412_v41 = vpop.f32.mrb[32].mxu0 }
0x2dac   :  { %v2413_v21 = vadd.f32 %v2552_v39, %v2412_v41  ;;  %v2901_v57 = vpop.f32.mrb[33].mxu0 }
0x2dae   :  { %v2416_v8 = vmax.f32 %v2413_v21, 0.0 }
0x2db0   :  { %2935 = vmatmul.mubr.f32.vlgmr.msra.gmra.mrb[16].mxu1 %v2416_v8 }
0x2e83   :  { %v2506_v23 = vpop.f32.mrb[16].mxu1 }
0x2e84   :  { %v2507_v33 = vadd.f32 %v2554_v22, %v2506_v23  ;;  %v2936_v24 = vpop.f32.mrb[17].mxu1 }
0x2e86   :  { %2510 = vst [vmem:[%s3852_s11] sm:$0xff] %v2507_v33 }
0x2e87   :  { %2515 = vsyncpa [#allocation7], 1 }
0x2e88   :  { %2516 = vsyncpa [#allocation9], 1 }
0x2e89   :  { %2517 = vsyncpa [#allocation12], 1 }

</bundles_post_ra>
